<compile_context>
chip_gen: v7x
topology: tpu7x:2x2x1
jax: 0.10.0
libtpu: 0.0.40
codegen_flags: <defaults>
</compile_context>

<pallas_src>
import jax
import jax.numpy as jnp
from jax.experimental import pallas as pl
from jax.experimental.pallas import tpu as pltpu
import numpy as np

_TILE_R = 512   # output-row tile of the incidence matmul
_TILE_K = 512   # reduction tile (fewer K passes -> less acc RMW traffic, esp. on v5e)
_LANE = 128     # feature-dim padding multiple (lane-dense stores, full MXU lanes)


def _round_up(v, m):
    return ((v + m - 1) // m) * m


def _pad2d(a, rows, cols):
    return jnp.pad(a, ((0, rows - a.shape[0]), (0, cols - a.shape[1])))


def _phase_kernel(a_ref, bw_ref, dinv_ref, alpha_ref, out_ref, acc_ref):
    """One output-row tile of: out = PReLU(dinv * (A @ BW)), accumulated over K tiles."""
    k = pl.program_id(1)

    @pl.when(k == 0)
    def _():
        acc_ref[...] = jnp.zeros_like(acc_ref)

    # Native bf16 x bf16 MXU matmul with f32 accumulation (no VPU up-cast of A).
    acc_ref[...] += jnp.dot(a_ref[...], bw_ref[...],
                            preferred_element_type=jnp.float32)

    @pl.when(k == pl.num_programs(1) - 1)
    def _():
        y = acc_ref[...] * dinv_ref[...]             # row-norm (De^-1 or Dn^-1)
        # TODO(synk): bias_n2e / bias_e2n are zero-initialized by the module and folded
        # out here; add a broadcast bias add before the PReLU if they become trainable.
        alpha = alpha_ref[0]
        out_ref[...] = jnp.where(y >= 0.0, y, alpha * y).astype(out_ref.dtype)


def _conv_phase(A, BW, dinv, alpha, out_dtype):
    """One ProposedConv half-layer: PReLU(dinv * (A @ BW)), A and BW streamed in bf16 tiles."""
    R, K = A.shape
    Kb, Fo = BW.shape
    assert K == Kb and dinv.shape == (R, 1)
    assert R % _TILE_R == 0 and K % _TILE_K == 0 and Fo % _LANE == 0
    assert A.dtype == jnp.bfloat16 and BW.dtype == jnp.bfloat16

    grid = (R // _TILE_R, K // _TILE_K)
    out_itemsize = np.dtype(out_dtype).itemsize
    cost = pl.CostEstimate(
        flops=2 * R * K * Fo,
        transcendentals=0,
        bytes_accessed=(R * K * 2                      # A, read once (bf16)
                        + (R // _TILE_R) * K * Fo * 2  # BW, re-streamed per row tile (bf16)
                        + R * Fo * out_itemsize        # output writeback
                        + R * 4))                      # dinv
    # TODO(synk): for many row tiles with small K*Fo, a resident-BW variant (index_map
    # (0,0) + in-kernel pl.ds slice) would remove the BW re-streams entirely; also
    # consider pipeline_mode=pl.Buffered(3) on A/BW if DMA is still exposed in xprof.
    return pl.pallas_call(
        _phase_kernel,
        out_shape=jax.ShapeDtypeStruct((R, Fo), out_dtype),
        grid_spec=pltpu.PrefetchScalarGridSpec(
            num_scalar_prefetch=0,
            grid=grid,
            in_specs=[
                pl.BlockSpec((_TILE_R, _TILE_K), lambda i, k: (i, k)),  # incidence tile (bf16)
                pl.BlockSpec((_TILE_K, Fo), lambda i, k: (k, 0)),       # pre-projected feats (bf16)
                pl.BlockSpec((_TILE_R, 1), lambda i, k: (i, 0)),        # 1/degree for output rows
                pl.BlockSpec(memory_space=pltpu.SMEM),                  # PReLU alpha, shape (1,)
            ],
            out_specs=pl.BlockSpec((_TILE_R, Fo), lambda i, k: (i, 0)),
            scratch_shapes=[pltpu.VMEM((_TILE_R, Fo), jnp.float32)],
        ),
        compiler_params=pltpu.CompilerParams(
            # Row-tile axis is parallel (shards across v7x's 2 TCs when R//_TILE_R >= 2),
            # reduction axis last and arbitrary.
            dimension_semantics=("parallel", "arbitrary"),
            vmem_limit_bytes=32 * 1024 * 1024),
        cost_estimate=cost,
    )(A, BW, dinv, alpha)


def glorot(key, fan_in, fan_out):
    limit = float(np.sqrt(6.0 / (fan_in + fan_out)))
    return jax.random.uniform(key, (fan_in, fan_out), jnp.float32, -limit, limit)


def init_hyper_encoder(key, in_dim, edge_dim, node_dim, num_layers=2):
    """Deterministic glorot weights (biases are zero-init in the module and folded out)."""
    params = []
    dims = [(in_dim, edge_dim, node_dim)] + [(node_dim, edge_dim, node_dim)] * (num_layers - 1)
    for (d_in, d_hid, d_out) in dims:
        key, k1, k2 = jax.random.split(key, 3)
        params.append(dict(w_n2e=glorot(k1, d_in, d_hid),
                           w_e2n=glorot(k2, d_hid, d_out)))
    alpha = jnp.array([0.25], jnp.float32)           # nn.PReLU() default init (shared instance)
    return params, alpha


def hyper_encoder_forward(x, hyperedge_index, num_nodes, num_edges, params, alpha):
    node_idx, edge_idx = hyperedge_index

    # Pad node/edge counts to the tile size (both act as rows in one phase and as the
    # reduction dim in the other, and _TILE_R == _TILE_K).
    Np = _round_up(num_nodes, _TILE_R)
    Ep = _round_up(num_edges, _TILE_R)

    # Dense (padded) incidence matrix and its transpose, each built directly by a scatter
    # (matches the module's aggr='add'; avoids a full XLA transpose of the N x E matrix).
    # bf16 is lossless for these small-integer counts (exact up to 256).
    H_bf = jnp.zeros((Np, Ep), jnp.float32).at[node_idx, edge_idx].add(1.0).astype(jnp.bfloat16)
    HT_bf = jnp.zeros((Ep, Np), jnp.float32).at[edge_idx, node_idx].add(1.0).astype(jnp.bfloat16)

    # Degrees computed once (reused by every layer), matching the module's scatter_add.
    Dn = jnp.zeros((Np,), jnp.float32).at[node_idx].add(1.0)
    De = jnp.zeros((Ep,), jnp.float32).at[edge_idx].add(1.0)
    Dn_inv = jnp.where(Dn > 0, 1.0 / Dn, 0.0).reshape(Np, 1)
    De_inv = jnp.where(De > 0, 1.0 / De, 0.0).reshape(Ep, 1)

    out_dim = params[-1]["w_e2n"].shape[1]
    num_layers = len(params)

    xb = _pad2d(x.astype(jnp.float32), Np, x.shape[1])   # pad rows only
    for li, p in enumerate(params):
        is_last = li == num_layers - 1
        d_in, d_hid = p["w_n2e"].shape
        _, d_out = p["w_e2n"].shape
        Fh = _round_up(d_hid, _LANE)
        Fo = _round_up(d_out, _LANE)

        # lin_n2e done in the wrapper (tiny matmul), streamed to the kernel in bf16.
        xw = jnp.dot(xb[:, :d_in].astype(jnp.float32), p["w_n2e"],
                     preferred_element_type=jnp.float32)
        xw = _pad2d(xw, Np, Fh).astype(jnp.bfloat16)

        # node -> edge: e = PReLU(De^-1 * (H^T @ (X W1)))  (conv's internal activation)
        e = _conv_phase(HT_bf, xw, De_inv, alpha, jnp.bfloat16)

        # lin_e2n done in the wrapper; padded columns of e are exactly zero.
        ew = jnp.dot(e[:, :d_hid].astype(jnp.float32), p["w_e2n"],
                     preferred_element_type=jnp.float32)
        ew = _pad2d(ew, Ep, Fo).astype(jnp.bfloat16)

        # edge -> node: x = PReLU(Dn^-1 * (H @ (E W2)))  (encoder's per-layer activation)
        out_dtype = jnp.float32 if is_last else jnp.bfloat16
        xb = _conv_phase(H_bf, ew, Dn_inv, alpha, out_dtype)

    # TODO(synk): for very sparse hypergraphs, replace the dense-H formulation with a
    # scalar-prefetch gather/scatter kernel over hyperedge_index (skips the O(N*E) zeros).
    return xb[:num_nodes, :out_dim]


def _reference_forward(x, hyperedge_index, num_nodes, num_edges, params, alpha):
    """Pure-JAX f32 reference (dense form of the module's message passing).

    Biases are zero at init and dropout(p=0) is identity."""
    node_idx, edge_idx = hyperedge_index
    H = jnp.zeros((num_nodes, num_edges), jnp.float32).at[node_idx, edge_idx].add(1.0)
    Dn = jnp.zeros((num_nodes,), jnp.float32).at[node_idx].add(1.0)
    De = jnp.zeros((num_edges,), jnp.float32).at[edge_idx].add(1.0)
    Dn_inv = jnp.where(Dn > 0, 1.0 / Dn, 0.0)[:, None]
    De_inv = jnp.where(De > 0, 1.0 / De, 0.0)[:, None]
    a = alpha[0]
    prelu = lambda v: jnp.where(v >= 0, v, a * v)
    for p in params:
        e = prelu(De_inv * (H.T @ (x @ p["w_n2e"])))
        x = prelu(Dn_inv * (H @ (e @ p["w_e2n"])))
    return x


if __name__ == "__main__":
    key = jax.random.PRNGKey(0)

    num_nodes, num_edges = 16, 8
    in_dim, edge_dim, node_dim = 16, 32, 16
    num_layers = 2

    key, kx = jax.random.split(key)
    x = jax.random.normal(kx, (num_nodes, in_dim), jnp.float32)

    # Synthetic incidence list: each node belongs to 2 distinct hyperedges (unique pairs).
    rng = np.random.default_rng(0)
    node_list, edge_list = [], []
    for n in range(num_nodes):
        for e in rng.choice(num_edges, size=2, replace=False):
            node_list.append(n)
            edge_list.append(int(e))
    hyperedge_index = jnp.array([node_list, edge_list], dtype=jnp.int32)

    params, alpha = init_hyper_encoder(key, in_dim, edge_dim, node_dim, num_layers)

    out = hyper_encoder_forward(x, hyperedge_index, num_nodes, num_edges, params, alpha)
    out = jax.block_until_ready(out)

    ref = _reference_forward(x, hyperedge_index, num_nodes, num_edges, params, alpha)
    # bf16 incidence / activations / streamed operands (f32 accumulation) -> ~1e-2 rel tolerance.
    np.testing.assert_allclose(np.asarray(out), np.asarray(ref), rtol=2e-2, atol=2e-2)

    assert out.shape == (num_nodes, node_dim)
    print("KERNEL_OK")
</pallas_src>

<mosaic_0001>
module attributes {stable_mosaic.version = 11 : i64} {
  func.func @_phase_kernel(%arg0: i32, %arg1: i32, %arg2: memref<512x512xbf16, #tpu.memory_space<vmem>>, %arg3: memref<512x128xbf16, #tpu.memory_space<vmem>>, %arg4: memref<512x1xf32, #tpu.memory_space<vmem>>, %arg5: memref<1xf32, #tpu.memory_space<smem>>, %arg6: memref<512x128xbf16, #tpu.memory_space<vmem>>, %arg7: memref<512x128xf32, #tpu.memory_space<vmem>>) attributes {dimension_semantics = [#tpu.dimension_semantics<parallel>, #tpu.dimension_semantics<arbitrary>], iteration_bounds = array<i64: 1, 1>, scalar_prefetch = 0 : i64, scratch_operands = 1 : i64, tpu.core_type = #tpu.core_type<tc>, window_params = [{transform_indices = @transform_0, window_bounds = array<i64: 512, 512>}, {transform_indices = @transform_1, window_bounds = array<i64: 512, 128>}, {transform_indices = @transform_2, window_bounds = array<i64: 512, 1>}, {transform_indices = @transform_3, window_bounds = array<i64: 1>}, {transform_indices = @transform_4, window_bounds = array<i64: 512, 128>}]} {
    %c0_i32 = arith.constant 0 : i32
    %0 = arith.cmpi eq, %arg1, %c0_i32 : i32
    %1 = arith.extui %0 : i1 to i32
    %c0_i32_0 = arith.constant 0 : i32
    %2 = arith.cmpi ne, %1, %c0_i32_0 : i32
    scf.if %2 {
      %cst_10 = arith.constant 0.000000e+00 : f32
      %12 = vector.broadcast %cst_10 : f32 to vector<512x128xf32>
      %c0_11 = arith.constant 0 : index
      %c0_12 = arith.constant 0 : index
      %13 = vector.load %arg7[%c0_11, %c0_12] : memref<512x128xf32, #tpu.memory_space<vmem>>, vector<512x128xf32>
      tpu.vector_store %arg7[%c0_11, %c0_12], %12 {strides = array<i32>} : memref<512x128xf32, #tpu.memory_space<vmem>>, vector<512x128xf32>,
    } else {
    }
    %c0 = arith.constant 0 : index
    %c0_1 = arith.constant 0 : index
    %3 = vector.load %arg7[%c0, %c0_1] : memref<512x128xf32, #tpu.memory_space<vmem>>, vector<512x128xf32>
    %c0_2 = arith.constant 0 : index
    %c0_3 = arith.constant 0 : index
    %4 = vector.load %arg2[%c0_2, %c0_3] : memref<512x512xbf16, #tpu.memory_space<vmem>>, vector<512x512xbf16>
    %c0_4 = arith.constant 0 : index
    %c0_5 = arith.constant 0 : index
    %5 = vector.load %arg3[%c0_4, %c0_5] : memref<512x128xbf16, #tpu.memory_space<vmem>>, vector<512x128xbf16>
    %cst = arith.constant dense<0.000000e+00> : vector<512x128xf32>
    %6 = tpu.matmul %4, %5, %cst {dimension_numbers = #tpu.dot_dimension_numbers<[1], [0], [0], [1], [0, 0, 1, 1], [], []>} : vector<512x512xbf16>, vector<512x128xbf16>, vector<512x128xf32> -> vector<512x128xf32>
    %7 = arith.addf %3, %6 : vector<512x128xf32>
    %c0_6 = arith.constant 0 : index
    %c0_7 = arith.constant 0 : index
    %8 = vector.load %arg7[%c0_6, %c0_7] : memref<512x128xf32, #tpu.memory_space<vmem>>, vector<512x128xf32>
    tpu.vector_store %arg7[%c0_6, %c0_7], %7 {strides = array<i32>} : memref<512x128xf32, #tpu.memory_space<vmem>>, vector<512x128xf32>,
    %c0_i32_8 = arith.constant 0 : i32
    %9 = arith.cmpi eq, %arg1, %c0_i32_8 : i32
    %10 = arith.extui %9 : i1 to i32
    %c0_i32_9 = arith.constant 0 : i32
    %11 = arith.cmpi ne, %10, %c0_i32_9 : i32
    scf.if %11 {
      %c0_10 = arith.constant 0 : index
      %c0_11 = arith.constant 0 : index
      %12 = vector.load %arg7[%c0_10, %c0_11] : memref<512x128xf32, #tpu.memory_space<vmem>>, vector<512x128xf32>
      %c0_12 = arith.constant 0 : index
      %c0_13 = arith.constant 0 : index
      %13 = vector.load %arg4[%c0_12, %c0_13] : memref<512x1xf32, #tpu.memory_space<vmem>>, vector<512x1xf32>
      %14 = vector.broadcast %13 : vector<512x1xf32> to vector<512x128xf32>
      %15 = arith.mulf %12, %14 : vector<512x128xf32>
      %c0_14 = arith.constant 0 : index
      %16 = memref.load %arg5[%c0_14] : memref<1xf32, #tpu.memory_space<smem>>
      %cst_15 = arith.constant 0.000000e+00 : f32
      %17 = vector.broadcast %cst_15 : f32 to vector<512x128xf32>
      %18 = arith.cmpf oge, %15, %17 : vector<512x128xf32>
      %19 = vector.broadcast %16 : f32 to vector<512x128xf32>
      %20 = arith.mulf %19, %15 : vector<512x128xf32>
      %21 = arith.select %18, %15, %20 : vector<512x128xi1>, vector<512x128xf32>
      %22 = arith.truncf %21 : vector<512x128xf32> to vector<512x128xbf16>
      %c0_16 = arith.constant 0 : index
      %c0_17 = arith.constant 0 : index
      %23 = vector.load %arg6[%c0_16, %c0_17] : memref<512x128xbf16, #tpu.memory_space<vmem>>, vector<512x128xbf16>
      tpu.vector_store %arg6[%c0_16, %c0_17], %22 {strides = array<i32>} : memref<512x128xbf16, #tpu.memory_space<vmem>>, vector<512x128xbf16>,
    } else {
    }
    return
  }
  func.func @transform_0(%arg0: i32, %arg1: i32) -> (i32, i32) {
    %c0_i32 = arith.constant 0 : i32
    return %arg0, %arg1 : i32, i32
  }
  func.func @transform_1(%arg0: i32, %arg1: i32) -> (i32, i32) {
    %c0_i32 = arith.constant 0 : i32
    %c0_i32_0 = arith.constant 0 : i32
    return %arg1, %c0_i32 : i32, i32
  }
  func.func @transform_2(%arg0: i32, %arg1: i32) -> (i32, i32) {
    %c0_i32 = arith.constant 0 : i32
    %c0_i32_0 = arith.constant 0 : i32
    return %arg0, %c0_i32 : i32, i32
  }
  func.func @transform_3(%arg0: i32, %arg1: i32) -> i32 {
    %c0_i32 = arith.constant 0 : i32
    %c0_i32_0 = arith.constant 0 : i32
    return %c0_i32 : i32
  }
  func.func @transform_4(%arg0: i32, %arg1: i32) -> (i32, i32) {
    %c0_i32 = arith.constant 0 : i32
    %c0_i32_0 = arith.constant 0 : i32
    return %arg0, %c0_i32 : i32, i32
  }
}

</mosaic_0001>

<bundles_post_ra>
// kernel: tpu_custom_call.1
= control target key start
LH: loop header
LB: loop body
LE: loop exit
PB: predicated region body
PF: predicated region fallthrough
CT: control target
= control target key end

     0   :  { %10 = vsyncpa [#allocation5], 0  ;;  %s4213_s0 = inlined_call_operand.hbm [shape: bf16[512,512], index: 0, kind: input, shape index: {}]   ;;  %s4214_s1 = inlined_call_operand.vmem [shape: bf16[512,128], index: 1, kind: input, shape index: {}]   ;;  %s4215_s2 = inlined_call_operand.vmem [shape: f32[512,1], index: 2, kind: input, shape index: {}]   ;;  %s4216_s3 = inlined_call_operand.<no memory space> [shape: f32[1], index: 3, kind: input, shape index: {}]   ;;  %s4217_s4 = inlined_call_operand.hbm [shape: bf16[512,128], index: 4, kind: output, shape index: {}]  }
   0x1   :  { %11 = vsyncpa [#allocation6], 0  ;;  %s3766_s15 = smov [#allocation4]   ;;  %s3718_s19 = scalar_lea.hbm %s4213_s0, 16384 }
   0x2   :  { %s17_s16 = sshll.u32 %s3766_s15, 4  ;;  %p3719_p0 = scmp.ne.s32.totalorder %s4213_s0, %s3718_s19  ;;  %s18_s16 = int_to_ptr.vmem [resolvable:$true] %s17_s16 }
   0x3   :  { %p3722_p1 = scmp.lt.u32.totalorder %s3718_s19, %s4213_s0 }
   0x5   :  { %p3724_p2 = pnand %p3722_p1, %p3719_p0 }
   0x7   :  { %3727 = shalt.err (!%p3724_p2)
}
   0x8   :  { %s3728_s24 = scalar_lea.vmem %s18_s16, 16384  ;;  %p3733_p4 = scmp.lt.s32.totalorder %s18_s16, %s18_s16 }
   0x9   :  { %p3729_p3 = scmp.ne.s32.totalorder %s18_s16, %s3728_s24  ;;  %p3734_p5 = scmp.lt.s32.totalorder %s3728_s24, %s3728_s24 }
   0xb   :  { %p3735_p6 = por %p3734_p5, %p3733_p4 }
   0xd   :  { %p3736_p7 = pnand %p3735_p6, %p3729_p3 }
   0xf   :  { %3739 = shalt.err (!%p3736_p7)
}
  0x10   :  { %s3767_s25 = smov 256   ;;  %s3768_s26 = smov 16  }
  0x11   :  { %23 = dma.hbm_to_vmem [thread:$0]  %s4213_s0, 16384, %s18_s16, [#allocation5], %s3767_s25, %s3767_s25, %s3768_s26  }
  0x12   :  { %3762 = dma.done.wait [#allocation5], 16384  }
  0x13   :  { %3763 = vsyncadd [#allocation5], 4294950912  ;;  %v3769_v0 = vmov 0   ;;  %v3494_v1 = vld [vmem:[%s4214_s1] sm:$0xff]   ;;  %v3496_v3 = vld [vmem:[%s4214_s1 + $0x8] sm:$0xff]  }
  0x14   :  { %1190 = vmatprep.subr.bf16.mxu1 %v3769_v0  ;;  %1479 = vmatprep.subr.bf16.mxu0 %v3769_v0  ;;  %v3495_v2 = vld [vmem:[%s4214_s1 + $0x80] sm:$0xff]   ;;  %v3497_v4 = vld [vmem:[%s4214_s1 + $0x88] sm:$0xff]   ;;  %v3498_v5 = vld [vmem:[%s4214_s1 + $0x10] sm:$0xff]  }
  0x15   :  { %3492 = vset.pattern.permute.xlu0 %v3769_v0  ;;  %3493 = vset.pattern.permute.xlu1 %v3769_v0  ;;  %v3499_v6 = vld [vmem:[%s4214_s1 + $0x90] sm:$0xff]   ;;  %v3500_v7 = vld [vmem:[%s4214_s1 + $0x18] sm:$0xff]   ;;  %v3502_v9 = vld [vmem:[%s4214_s1 + $0x20] sm:$0xff]  }
  0x16   :  { %1191 = vmatpush1.bf16.msra.mxu1 %v3494_v1  ;;  %1480 = vmatpush1.bf16.msra.mxu0 %v3495_v2  ;;  %v3501_v8 = vld [vmem:[%s4214_s1 + $0x98] sm:$0xff]   ;;  %v3503_v10 = vld [vmem:[%s4214_s1 + $0xa0] sm:$0xff]   ;;  %v3504_v11 = vld [vmem:[%s4214_s1 + $0x28] sm:$0xff]  }
  0x17   :  { %1192 = vmatprep.subr.bf16.mxu1 %v3769_v0  ;;  %1481 = vmatprep.subr.bf16.mxu0 %v3769_v0  ;;  %v3505_v12 = vld [vmem:[%s4214_s1 + $0xa8] sm:$0xff]   ;;  %v3506_v13 = vld [vmem:[%s4214_s1 + $0x30] sm:$0xff]   ;;  %v3508_v15 = vld [vmem:[%s4214_s1 + $0x38] sm:$0xff]  }
  0x18   :  { %v3507_v14 = vld [vmem:[%s4214_s1 + $0xb0] sm:$0xff]   ;;  %v3509_v16 = vld [vmem:[%s4214_s1 + $0xb8] sm:$0xff]   ;;  %v3510_v17 = vld [vmem:[%s4214_s1 + $0x40] sm:$0xff]  }
  0x19   :  { %v3511_v18 = vld [vmem:[%s4214_s1 + $0xc0] sm:$0xff]   ;;  %v3512_v20 = vld [vmem:[%s4214_s1 + $0x48] sm:$0xff]   ;;  %v3514_v23 = vld [vmem:[%s4214_s1 + $0x50] sm:$0xff]  }
  0x1a   :  { %1193 = vmatpush1.bf16.msra.mxu1 %v3496_v3  ;;  %1482 = vmatpush1.bf16.msra.mxu0 %v3497_v4  ;;  %v3528_v19 = vld [vmem:[#allocation4 + $0x4] ss:$16 sps:$4 sm:$0xff]   ;;  %v3531_v21 = vld [vmem:[#allocation4 + $0xc] ss:$16 sps:$4 sm:$0xff]   ;;  %v3526_v35 = vld [vmem:[#allocation4] ss:$16 sps:$4 sm:$0xff]  }
  0x1b   :  { %1194 = vmatprep.subr.bf16.mxu1 %v3769_v0  ;;  %1483 = vmatprep.subr.bf16.mxu0 %v3769_v0  ;;  %v3513_v22 = vld [vmem:[%s4214_s1 + $0xc8] sm:$0xff]   ;;  %v3515_v24 = vld [vmem:[%s4214_s1 + $0xd0] sm:$0xff]   ;;  %v3516_v25 = vld [vmem:[%s4214_s1 + $0x58] sm:$0xff]  }
  0x1c   :  { %1222 = vmatprep.mubr.bf16.mxu1 %v3528_v19  ;;  %1511 = vmatprep.mubr.bf16.mxu0 %v3531_v21  ;;  %v3517_v26 = vld [vmem:[%s4214_s1 + $0xd8] sm:$0xff]   ;;  %v3518_v27 = vld [vmem:[%s4214_s1 + $0x60] sm:$0xff]   ;;  %v3520_v29 = vld [vmem:[%s4214_s1 + $0x68] sm:$0xff]  }
  0x1d   :  { %v3519_v28 = vld [vmem:[%s4214_s1 + $0xe0] sm:$0xff]   ;;  %v3521_v30 = vld [vmem:[%s4214_s1 + $0xe8] sm:$0xff]   ;;  %v3522_v31 = vld [vmem:[%s4214_s1 + $0x70] sm:$0xff]  }
  0x1e   :  { %1195 = vmatpush1.bf16.msra.mxu1 %v3498_v5  ;;  %1484 = vmatpush1.bf16.msra.mxu0 %v3499_v6  ;;  %v3523_v32 = vld [vmem:[%s4214_s1 + $0xf0] sm:$0xff]   ;;  %v3524_v33 = vld [vmem:[%s4214_s1 + $0x78] sm:$0xff]   ;;  %v1963_v37 = vld [vmem:[%s4215_s2] sm:$0xff] }
  0x1f   :  { %1196 = vmatprep.subr.bf16.mxu1 %v3769_v0  ;;  %1485 = vmatprep.subr.bf16.mxu0 %v3769_v0  ;;  %v3525_v34 = vld [vmem:[%s4214_s1 + $0xf8] sm:$0xff]   ;;  %v3532_v38 = vld [vmem:[#allocation4 + $0x24] ss:$16 sps:$4 sm:$0xff]   ;;  %v1964_v41 = vld [vmem:[%s4215_s2 + $0x8] sm:$0xff] }
  0x20   :  { %v3529_v36 = vld [vmem:[#allocation4 + $0x8] ss:$16 sps:$4 sm:$0xff]   ;;  %2029 = vperm.xlu0 %3492, %v1963_v37   ;;  %v3534_v39 = vld [vmem:[#allocation4 + $0x2c] ss:$16 sps:$4 sm:$0xff]   ;;  %v1965_v40 = vld [vmem:[%s4215_s2 + $0x10] sm:$0xff] }
  0x21   :  { %2039 = vperm.xlu1 %3493, %v1965_v40   ;;  %v1966_v42 = vld [vmem:[%s4215_s2 + $0x18] sm:$0xff]  ;;  %v3536_v43 = vld [vmem:[#allocation4 + $0x20] ss:$16 sps:$4 sm:$0xff]   ;;  %v1968_v46 = vld [vmem:[%s4215_s2 + $0x28] sm:$0xff] }
  0x22   :  { %1197 = vmatpush1.bf16.msra.mxu1 %v3500_v7  ;;  %1486 = vmatpush1.bf16.msra.mxu0 %v3501_v8  ;;  %v3537_v44 = vld [vmem:[#allocation4 + $0x28] ss:$16 sps:$4 sm:$0xff]   ;;  %v1967_v45 = vld [vmem:[%s4215_s2 + $0x20] sm:$0xff]  ;;  %v3540_v48 = vld [vmem:[#allocation4 + $0x4c] ss:$16 sps:$4 sm:$0xff]  }
  0x23   :  { %1198 = vmatprep.subr.bf16.mxu1 %v3769_v0  ;;  %1487 = vmatprep.subr.bf16.mxu0 %v3769_v0  ;;  %v3538_v47 = vld [vmem:[#allocation4 + $0x44] ss:$16 sps:$4 sm:$0xff]   ;;  %v1970_v50 = vld [vmem:[%s4215_s2 + $0x38] sm:$0xff]  ;;  %v3542_v51 = vld [vmem:[#allocation4 + $0x40] ss:$16 sps:$4 sm:$0xff]  }
  0x24   :  { %2034 = vperm.xlu0 %3492, %v1964_v41   ;;  %v1969_v49 = vld [vmem:[%s4215_s2 + $0x30] sm:$0xff]  ;;  %v3543_v52 = vld [vmem:[#allocation4 + $0x48] ss:$16 sps:$4 sm:$0xff]   ;;  %v1971_v53 = vld [vmem:[%s4215_s2 + $0x40] sm:$0xff] }
  0x25   :  { %2044 = vperm.xlu1 %3493, %v1966_v42   ;;  %v1972_v54 = vld [vmem:[%s4215_s2 + $0x48] sm:$0xff]  ;;  %v3544_v55 = vld [vmem:[#allocation4 + $0x64] ss:$16 sps:$4 sm:$0xff]   ;;  %v1974_v58 = vld [vmem:[%s4215_s2 + $0x58] sm:$0xff] }
  0x26   :  { %1199 = vmatpush1.bf16.msra.mxu1 %v3502_v9  ;;  %1488 = vmatpush1.bf16.msra.mxu0 %v3503_v10  ;;  %v3546_v56 = vld [vmem:[#allocation4 + $0x6c] ss:$16 sps:$4 sm:$0xff]   ;;  %v1973_v57 = vld [vmem:[%s4215_s2 + $0x50] sm:$0xff]  ;;  %v3549_v60 = vld [vmem:[#allocation4 + $0x68] ss:$16 sps:$4 sm:$0xff]  }
  0x27   :  { %1200 = vmatprep.subr.bf16.mxu1 %v3769_v0  ;;  %1489 = vmatprep.subr.bf16.mxu0 %v3769_v0  ;;  %v3548_v59 = vld [vmem:[#allocation4 + $0x60] ss:$16 sps:$4 sm:$0xff]   ;;  %v1976_v62 = vld [vmem:[%s4215_s2 + $0x68] sm:$0xff]  ;;  %v3550_v63 = vld [vmem:[#allocation4 + $0x84] ss:$16 sps:$4 sm:$0xff]  }
  0x28   :  { %2049 = vperm.xlu0 %3492, %v1967_v45   ;;  %v1975_v61 = vld [vmem:[%s4215_s2 + $0x60] sm:$0xff]  ;;  %v1977_v1 = vld [vmem:[%s4215_s2 + $0x70] sm:$0xff]  ;;  %v1978_v2 = vld [vmem:[%s4215_s2 + $0x78] sm:$0xff] }
  0x29   :  { %2054 = vperm.xlu1 %3493, %v1968_v46   ;;  %v3554_v3 = vld [vmem:[#allocation4 + $0x80] ss:$16 sps:$4 sm:$0xff]   ;;  %v3555_v4 = vld [vmem:[#allocation4 + $0x88] ss:$16 sps:$4 sm:$0xff]   ;;  %v3556_v7 = vld [vmem:[#allocation4 + $0xa4] ss:$16 sps:$4 sm:$0xff]  }
  0x2a   :  { %1201 = vmatpush1.bf16.msra.mxu1 %v3504_v11  ;;  %1490 = vmatpush1.bf16.msra.mxu0 %v3505_v12  ;;  %v1979_v5 = vld [vmem:[%s4215_s2 + $0x80] sm:$0xff]  ;;  %v1980_v6 = vld [vmem:[%s4215_s2 + $0x88] sm:$0xff]  ;;  %v1981_v9 = vld [vmem:[%s4215_s2 + $0x90] sm:$0xff] }
  0x2b   :  { %1202 = vmatprep.subr.bf16.mxu1 %v3769_v0  ;;  %1491 = vmatprep.subr.bf16.mxu0 %v3769_v0  ;;  %v3558_v8 = vld [vmem:[#allocation4 + $0xac] ss:$16 sps:$4 sm:$0xff]   ;;  %v3560_v11 = vld [vmem:[#allocation4 + $0xa0] ss:$16 sps:$4 sm:$0xff]   ;;  %v3561_v12 = vld [vmem:[#allocation4 + $0xa8] ss:$16 sps:$4 sm:$0xff]  }
  0x2c   :  { %2059 = vperm.xlu0 %3492, %v1969_v49   ;;  %v1982_v10 = vld [vmem:[%s4215_s2 + $0x98] sm:$0xff]  ;;  %v3566_v19 = vld [vmem:[#allocation4 + $0xc0] ss:$16 sps:$4 sm:$0xff]   ;;  %v1996_v37 = vld [vmem:[%s4215_s2 + $0x108] sm:$0xff] }
  0x2d   :  { %2064 = vperm.xlu1 %3493, %v1970_v50   ;;  %v3567_v21 = vld [vmem:[#allocation4 + $0xc8] ss:$16 sps:$4 sm:$0xff]   ;;  %v3582_v40 = vld [vmem:[#allocation4 + $0x12c] ss:$16 sps:$4 sm:$0xff]   ;;  %v1997_v41 = vld [vmem:[%s4215_s2 + $0x110] sm:$0xff] }
  0x2e   :  { %1203 = vmatpush1.bf16.msra.mxu1 %v3506_v13  ;;  %1492 = vmatpush1.bf16.msra.mxu0 %v3507_v14  ;;  %v1983_v13 = vld [vmem:[%s4215_s2 + $0xa0] sm:$0xff]  ;;  %v1984_v14 = vld [vmem:[%s4215_s2 + $0xa8] sm:$0xff]  ;;  %v1998_v42 = vld [vmem:[%s4215_s2 + $0x118] sm:$0xff] }
  0x2f   :  { %1204 = vmatprep.subr.bf16.mxu1 %v3769_v0  ;;  %1493 = vmatprep.subr.bf16.mxu0 %v3769_v0  ;;  %v2000_v45 = vld [vmem:[%s4215_s2 + $0x128] sm:$0xff]  ;;  %v2001_v49 = vld [vmem:[%s4215_s2 + $0x130] sm:$0xff]  ;;  %v2002_v50 = vld [vmem:[%s4215_s2 + $0x138] sm:$0xff] }
  0x30   :  { %2069 = vperm.xlu0 %3492, %v1971_v53   ;;  %v3585_v46 = vld [vmem:[#allocation4 + $0x128] ss:$16 sps:$4 sm:$0xff]  }
  0x31   :  { %2074 = vperm.xlu1 %3493, %v1972_v54   ;;  %v2004_v53 = vld [vmem:[%s4215_s2 + $0x148] sm:$0xff] }
  0x32   :  { %1205 = vmatpush1.bf16.msra.mxu1 %v3508_v15  ;;  %1494 = vmatpush1.bf16.msra.mxu0 %v3509_v16  ;;  %v3562_v15 = vld [vmem:[#allocation4 + $0xc4] ss:$16 sps:$4 sm:$0xff]   ;;  %v3564_v16 = vld [vmem:[#allocation4 + $0xcc] ss:$16 sps:$4 sm:$0xff]   ;;  %v3591_v54 = vld [vmem:[#allocation4 + $0x148] ss:$16 sps:$4 sm:$0xff]  }
  0x33   :  { %1206 = vmatprep.subr.bf16.mxu1 %v3769_v0  ;;  %1495 = vmatprep.subr.bf16.mxu0 %v3769_v0 }
  0x34   :  { %2079 = vperm.xlu0 %3492, %v1973_v57   ;;  %v2005_v57 = vld [vmem:[%s4215_s2 + $0x150] sm:$0xff] }
  0x35   :  { %2084 = vperm.xlu1 %3493, %v1974_v58   ;;  %v2006_v58 = vld [vmem:[%s4215_s2 + $0x158] sm:$0xff] }
  0x36   :  { %1207 = vmatpush1.bf16.msra.mxu1 %v3510_v17  ;;  %1496 = vmatpush1.bf16.msra.mxu0 %v3511_v18  ;;  %v1986_v17 = vld [vmem:[%s4215_s2 + $0xb8] sm:$0xff]  ;;  %v1985_v18 = vld [vmem:[%s4215_s2 + $0xb0] sm:$0xff] }
  0x37   :  { %1208 = vmatprep.subr.bf16.mxu1 %v3769_v0  ;;  %1497 = vmatprep.subr.bf16.mxu0 %v3769_v0 }
  0x38   :  { %2089 = vperm.xlu0 %3492, %v1975_v61   ;;  %v2008_v61 = vld [vmem:[%s4215_s2 + $0x168] sm:$0xff] }
  0x39   :  { %2094 = vperm.xlu1 %3493, %v1976_v62   ;;  %v3597_v62 = vld [vmem:[#allocation4 + $0x168] ss:$16 sps:$4 sm:$0xff]  }
  0x3a   :  { %1209 = vmatpush1.bf16.msra.mxu1 %v3512_v20  ;;  %1498 = vmatpush1.bf16.msra.mxu0 %v3513_v22  ;;  %v1988_v20 = vld [vmem:[%s4215_s2 + $0xc8] sm:$0xff]  ;;  %v3568_v22 = vld [vmem:[#allocation4 + $0xe4] ss:$16 sps:$4 sm:$0xff]  }
  0x3b   :  { %1210 = vmatprep.subr.bf16.mxu1 %v3769_v0  ;;  %1499 = vmatprep.subr.bf16.mxu0 %v3769_v0 }
  0x3c   :  { %2099 = vperm.xlu0 %3492, %v1977_v1   ;;  %v2009_v1 = vld [vmem:[%s4215_s2 + $0x170] sm:$0xff] }
  0x3d   :  { %2104 = vperm.xlu1 %3493, %v1978_v2   ;;  %v2010_v2 = vld [vmem:[%s4215_s2 + $0x178] sm:$0xff] }
  0x3e   :  { %1211 = vmatpush1.bf16.msra.mxu1 %v3514_v23  ;;  %1500 = vmatpush1.bf16.msra.mxu0 %v3515_v24  ;;  %v1987_v23 = vld [vmem:[%s4215_s2 + $0xc0] sm:$0xff]  ;;  %v3570_v24 = vld [vmem:[#allocation4 + $0xec] ss:$16 sps:$4 sm:$0xff]  }
  0x3f   :  { %1212 = vmatprep.subr.bf16.mxu1 %v3769_v0  ;;  %1501 = vmatprep.subr.bf16.mxu0 %v3769_v0 }
  0x40   :  { %2109 = vperm.xlu0 %3492, %v1979_v5   ;;  %v2012_v5 = vld [vmem:[%s4215_s2 + $0x188] sm:$0xff] }
  0x41   :  { %2114 = vperm.xlu1 %3493, %v1980_v6   ;;  %v3603_v6 = vld [vmem:[#allocation4 + $0x188] ss:$16 sps:$4 sm:$0xff]  }
  0x42   :  { %1213 = vmatpush1.bf16.msra.mxu1 %v3516_v25  ;;  %1502 = vmatpush1.bf16.msra.mxu0 %v3517_v26  ;;  %v1990_v25 = vld [vmem:[%s4215_s2 + $0xd8] sm:$0xff]  ;;  %v1989_v26 = vld [vmem:[%s4215_s2 + $0xd0] sm:$0xff] }
  0x43   :  { %1214 = vmatprep.subr.bf16.mxu1 %v3769_v0  ;;  %1503 = vmatprep.subr.bf16.mxu0 %v3769_v0 }
  0x44   :  { %2119 = vperm.xlu0 %3492, %v1981_v9   ;;  %v2013_v9 = vld [vmem:[%s4215_s2 + $0x190] sm:$0xff] }
  0x45   :  { %2124 = vperm.xlu1 %3493, %v1982_v10   ;;  %v2014_v10 = vld [vmem:[%s4215_s2 + $0x198] sm:$0xff] }
  0x46   :  { %1215 = vmatpush1.bf16.msra.mxu1 %v3518_v27  ;;  %1504 = vmatpush1.bf16.msra.mxu0 %v3519_v28  ;;  %v3572_v27 = vld [vmem:[#allocation4 + $0xe0] ss:$16 sps:$4 sm:$0xff]   ;;  %v1992_v28 = vld [vmem:[%s4215_s2 + $0xe8] sm:$0xff] }
  0x47   :  { %1216 = vmatprep.subr.bf16.mxu1 %v3769_v0  ;;  %1505 = vmatprep.subr.bf16.mxu0 %v3769_v0 }
  0x48   :  { %2129 = vperm.xlu0 %3492, %v1983_v13   ;;  %v2016_v13 = vld [vmem:[%s4215_s2 + $0x1a8] sm:$0xff] }
  0x49   :  { %2134 = vperm.xlu1 %3493, %v1984_v14   ;;  %v3609_v14 = vld [vmem:[#allocation4 + $0x1a8] ss:$16 sps:$4 sm:$0xff]  }
  0x4a   :  { %1217 = vmatpush1.bf16.msra.mxu1 %v3520_v29  ;;  %1506 = vmatpush1.bf16.msra.mxu0 %v3521_v30  ;;  %v3573_v29 = vld [vmem:[#allocation4 + $0xe8] ss:$16 sps:$4 sm:$0xff]   ;;  %v3574_v30 = vld [vmem:[#allocation4 + $0x104] ss:$16 sps:$4 sm:$0xff]  }
  0x4b   :  { %1218 = vmatprep.subr.bf16.mxu1 %v3769_v0  ;;  %1507 = vmatprep.subr.bf16.mxu0 %v3769_v0 }
  0x4c   :  { %2139 = vperm.xlu0 %3492, %v1985_v18   ;;  %v2018_v18 = vld [vmem:[%s4215_s2 + $0x1b8] sm:$0xff] }
  0x4d   :  { %2144 = vperm.xlu1 %3493, %v1986_v17   ;;  %v2017_v17 = vld [vmem:[%s4215_s2 + $0x1b0] sm:$0xff] }
  0x4e   :  { %1219 = vmatpush1.bf16.msra.mxu1 %v3522_v31  ;;  %1508 = vmatpush1.bf16.msra.mxu0 %v3523_v32  ;;  %v1991_v31 = vld [vmem:[%s4215_s2 + $0xe0] sm:$0xff]  ;;  %v3576_v32 = vld [vmem:[#allocation4 + $0x10c] ss:$16 sps:$4 sm:$0xff]  }
  0x4f   :  { %1220 = vmatprep.subr.bf16.mxu1 %v3769_v0  ;;  %1509 = vmatprep.subr.bf16.mxu0 %v3769_v0  ;;  %v3552_v0 = vld [vmem:[#allocation4 + $0x8c] ss:$16 sps:$4 sm:$0xff]  }
  0x50   :  { %2149 = vperm.xlu0 %3492, %v1987_v23   ;;  %v3616_v23 = vld [vmem:[#allocation4 + $0x1e4] ss:$16 sps:$4 sm:$0xff]  }
  0x51   :  { %2154 = vperm.xlu1 %3493, %v1988_v20   ;;  %v3614_v20 = vld [vmem:[#allocation4 + $0x1c0] ss:$16 sps:$4 sm:$0xff]  }
  0x52   :  { %1221 = vmatpush1.bf16.msra.mxu1 %v3524_v33  ;;  %1510 = vmatpush1.bf16.msra.mxu0 %v3525_v34  ;;  %v1994_v33 = vld [vmem:[%s4215_s2 + $0xf8] sm:$0xff]  ;;  %v1993_v34 = vld [vmem:[%s4215_s2 + $0xf0] sm:$0xff] }
  0x54   :  { %2159 = vperm.xlu0 %3492, %v1989_v26   ;;  %v2022_v26 = vld [vmem:[%s4215_s2 + $0x1d8] sm:$0xff] }
  0x55   :  { %1223 = vmatmul.mubr.bf16.vlgmr.msra.gmra.mrb[0].mxu1 %v3526_v35  ;;  %1512 = vmatmul.mubr.bf16.vlgmr.msra.gmra.mrb[0].mxu0 %v3529_v36  ;;  %v3578_v35 = vld [vmem:[#allocation4 + $0x100] ss:$16 sps:$4 sm:$0xff]  }
  0x56   :  { %1230 = vmatprep.mubr.bf16.mxu1 %v3532_v38  ;;  %1519 = vmatprep.mubr.bf16.mxu0 %v3534_v39  ;;  %v1995_v36 = vld [vmem:[%s4215_s2 + $0x100] sm:$0xff]  ;;  %v3579_v38 = vld [vmem:[#allocation4 + $0x108] ss:$16 sps:$4 sm:$0xff]  }
  0x57   :  { %2164 = vperm.xlu1 %3493, %v1990_v25   ;;  %v3580_v39 = vld [vmem:[#allocation4 + $0x124] ss:$16 sps:$4 sm:$0xff]  }
  0x58   :  { %2169 = vperm.xlu0 %3492, %v1991_v31   ;;  %v2021_v25 = vld [vmem:[%s4215_s2 + $0x1d0] sm:$0xff] }
  0x59   :  { %v3622_v31 = vld [vmem:[#allocation4 + $0x204] ss:$16 sps:$4 sm:$0xff]  }
  0x5b   :  { %2174 = vperm.xlu1 %3493, %v1992_v28   ;;  %v3620_v28 = vld [vmem:[#allocation4 + $0x1e0] ss:$16 sps:$4 sm:$0xff]  }
  0x5c   :  { %2179 = vperm.xlu0 %3492, %v1993_v34   ;;  %v2026_v34 = vld [vmem:[%s4215_s2 + $0x1f8] sm:$0xff] }
  0x5d   :  { %1231 = vmatmul.mubr.bf16.gmra.mrb[4].mxu1 %v3536_v43  ;;  %1520 = vmatmul.mubr.bf16.gmra.mrb[4].mxu0 %v3537_v44  ;;  %v1999_v43 = vld [vmem:[%s4215_s2 + $0x120] sm:$0xff] }
  0x5e   :  { %1238 = vmatprep.mubr.bf16.mxu1 %v3538_v47  ;;  %1527 = vmatprep.mubr.bf16.mxu0 %v3540_v48  ;;  %v3584_v44 = vld [vmem:[#allocation4 + $0x120] ss:$16 sps:$4 sm:$0xff]   ;;  %v3586_v47 = vld [vmem:[#allocation4 + $0x144] ss:$16 sps:$4 sm:$0xff]   ;;  %v3588_v48 = vld [vmem:[#allocation4 + $0x14c] ss:$16 sps:$4 sm:$0xff]  }
  0x5f   :  { %2184 = vperm.xlu1 %3493, %v1994_v33   ;;  %v2025_v33 = vld [vmem:[%s4215_s2 + $0x1f0] sm:$0xff] }
  0x60   :  { %2189 = vperm.xlu0 %3492, %v1995_v36   ;;  %v3627_v36 = vld [vmem:[#allocation4 + $0x208] ss:$16 sps:$4 sm:$0xff]  }
  0x63   :  { %2194 = vperm.xlu1 %3493, %v1996_v37   ;;  %v3628_v37 = vld [vmem:[#allocation4 + $0x224] ss:$16 sps:$4 sm:$0xff]  }
  0x64   :  { %2199 = vperm.xlu0 %3492, %v1997_v41   ;;  %v3634_v41 = vld [vmem:[#allocation4 + $0x244] ss:$16 sps:$4 sm:$0xff]  }
  0x65   :  { %1239 = vmatmul.mubr.bf16.gmra.mrb[8].mxu1 %v3542_v51  ;;  %1528 = vmatmul.mubr.bf16.gmra.mrb[8].mxu0 %v3543_v52  ;;  %v2003_v51 = vld [vmem:[%s4215_s2 + $0x140] sm:$0xff] }
  0x66   :  { %1246 = vmatprep.mubr.bf16.mxu1 %v3544_v55  ;;  %1535 = vmatprep.mubr.bf16.mxu0 %v3546_v56  ;;  %v3590_v52 = vld [vmem:[#allocation4 + $0x140] ss:$16 sps:$4 sm:$0xff]   ;;  %v3592_v55 = vld [vmem:[#allocation4 + $0x164] ss:$16 sps:$4 sm:$0xff]   ;;  %v3594_v56 = vld [vmem:[#allocation4 + $0x16c] ss:$16 sps:$4 sm:$0xff]  }
  0x67   :  { %2204 = vperm.xlu1 %3493, %v1998_v42   ;;  %v3636_v42 = vld [vmem:[#allocation4 + $0x24c] ss:$16 sps:$4 sm:$0xff]  }
  0x68   :  { %2209 = vperm.xlu0 %3492, %v1999_v43   ;;  %v3638_v43 = vld [vmem:[#allocation4 + $0x240] ss:$16 sps:$4 sm:$0xff]  }
  0x6b   :  { %2214 = vperm.xlu1 %3493, %v2000_v45   ;;  %v3640_v45 = vld [vmem:[#allocation4 + $0x264] ss:$16 sps:$4 sm:$0xff]  }
  0x6c   :  { %2219 = vperm.xlu0 %3492, %v2001_v49   ;;  %v3646_v49 = vld [vmem:[#allocation4 + $0x284] ss:$16 sps:$4 sm:$0xff]  }
  0x6d   :  { %1247 = vmatmul.mubr.bf16.gmra.mrb[12].mxu1 %v3548_v59  ;;  %1536 = vmatmul.mubr.bf16.gmra.mrb[12].mxu0 %v3549_v60  ;;  %v2007_v59 = vld [vmem:[%s4215_s2 + $0x160] sm:$0xff] }
  0x6e   :  { %1254 = vmatprep.mubr.bf16.mxu1 %v3550_v63  ;;  %1543 = vmatprep.mubr.bf16.mxu0 %v3552_v0  ;;  %v3596_v60 = vld [vmem:[#allocation4 + $0x160] ss:$16 sps:$4 sm:$0xff]   ;;  %v3598_v63 = vld [vmem:[#allocation4 + $0x184] ss:$16 sps:$4 sm:$0xff]   ;;  %v3600_v0 = vld [vmem:[#allocation4 + $0x18c] ss:$16 sps:$4 sm:$0xff]  }
  0x6f   :  { %2224 = vperm.xlu1 %3493, %v2002_v50   ;;  %v3648_v50 = vld [vmem:[#allocation4 + $0x28c] ss:$16 sps:$4 sm:$0xff]  }
  0x70   :  { %2229 = vperm.xlu0 %3492, %v2003_v51   ;;  %v3650_v51 = vld [vmem:[#allocation4 + $0x280] ss:$16 sps:$4 sm:$0xff]  }
  0x73   :  { %2234 = vperm.xlu1 %3493, %v2004_v53   ;;  %v3652_v53 = vld [vmem:[#allocation4 + $0x2a4] ss:$16 sps:$4 sm:$0xff]  }
  0x74   :  { %2239 = vperm.xlu0 %3492, %v2005_v57   ;;  %v3658_v57 = vld [vmem:[#allocation4 + $0x2c4] ss:$16 sps:$4 sm:$0xff]  }
  0x75   :  { %1255 = vmatmul.mubr.bf16.gmra.mrb[16].mxu1 %v3554_v3  ;;  %1544 = vmatmul.mubr.bf16.gmra.mrb[16].mxu0 %v3555_v4  ;;  %v2011_v3 = vld [vmem:[%s4215_s2 + $0x180] sm:$0xff] }
  0x76   :  { %1262 = vmatprep.mubr.bf16.mxu1 %v3556_v7  ;;  %1551 = vmatprep.mubr.bf16.mxu0 %v3558_v8  ;;  %v3602_v4 = vld [vmem:[#allocation4 + $0x180] ss:$16 sps:$4 sm:$0xff]   ;;  %v3604_v7 = vld [vmem:[#allocation4 + $0x1a4] ss:$16 sps:$4 sm:$0xff]   ;;  %v3606_v8 = vld [vmem:[#allocation4 + $0x1ac] ss:$16 sps:$4 sm:$0xff]  }
  0x77   :  { %2244 = vperm.xlu1 %3493, %v2006_v58   ;;  %v3660_v58 = vld [vmem:[#allocation4 + $0x2cc] ss:$16 sps:$4 sm:$0xff]  }
  0x78   :  { %2249 = vperm.xlu0 %3492, %v2007_v59   ;;  %v3662_v59 = vld [vmem:[#allocation4 + $0x2c0] ss:$16 sps:$4 sm:$0xff]  }
  0x7b   :  { %2254 = vperm.xlu1 %3493, %v2008_v61   ;;  %v3664_v61 = vld [vmem:[#allocation4 + $0x2e4] ss:$16 sps:$4 sm:$0xff]  }
  0x7c   :  { %2259 = vperm.xlu0 %3492, %v2009_v1   ;;  %v3670_v1 = vld [vmem:[#allocation4 + $0x304] ss:$16 sps:$4 sm:$0xff]  }
  0x7d   :  { %1263 = vmatmul.mubr.bf16.gmra.mrb[20].mxu1 %v3560_v11  ;;  %1552 = vmatmul.mubr.bf16.gmra.mrb[20].mxu0 %v3561_v12  ;;  %v2015_v11 = vld [vmem:[%s4215_s2 + $0x1a0] sm:$0xff] }
  0x7e   :  { %1270 = vmatprep.mubr.bf16.mxu1 %v3562_v15  ;;  %1559 = vmatprep.mubr.bf16.mxu0 %v3564_v16  ;;  %v3608_v12 = vld [vmem:[#allocation4 + $0x1a0] ss:$16 sps:$4 sm:$0xff]   ;;  %v3610_v15 = vld [vmem:[#allocation4 + $0x1c4] ss:$16 sps:$4 sm:$0xff]   ;;  %v3612_v16 = vld [vmem:[#allocation4 + $0x1cc] ss:$16 sps:$4 sm:$0xff]  }
  0x7f   :  { %2264 = vperm.xlu1 %3493, %v2010_v2   ;;  %v3672_v2 = vld [vmem:[#allocation4 + $0x30c] ss:$16 sps:$4 sm:$0xff]  }
  0x80   :  { %2269 = vperm.xlu0 %3492, %v2011_v3   ;;  %v3674_v3 = vld [vmem:[#allocation4 + $0x300] ss:$16 sps:$4 sm:$0xff]  }
  0x83   :  { %2274 = vperm.xlu1 %3493, %v2012_v5   ;;  %v3676_v5 = vld [vmem:[#allocation4 + $0x324] ss:$16 sps:$4 sm:$0xff]  }
  0x84   :  { %2279 = vperm.xlu0 %3492, %v2013_v9   ;;  %v3682_v9 = vld [vmem:[#allocation4 + $0x344] ss:$16 sps:$4 sm:$0xff]  }
  0x85   :  { %1271 = vmatmul.mubr.bf16.gmra.mrb[24].mxu1 %v3566_v19  ;;  %1560 = vmatmul.mubr.bf16.gmra.mrb[24].mxu0 %v3567_v21  ;;  %v2019_v19 = vld [vmem:[%s4215_s2 + $0x1c0] sm:$0xff]  ;;  %v2020_v21 = vld [vmem:[%s4215_s2 + $0x1c8] sm:$0xff] }
  0x86   :  { %1278 = vmatprep.mubr.bf16.mxu1 %v3568_v22  ;;  %1567 = vmatprep.mubr.bf16.mxu0 %v3570_v24  ;;  %v3615_v22 = vld [vmem:[#allocation4 + $0x1c8] ss:$16 sps:$4 sm:$0xff]   ;;  %v3618_v24 = vld [vmem:[#allocation4 + $0x1ec] ss:$16 sps:$4 sm:$0xff]  }
  0x87   :  { %2284 = vperm.xlu1 %3493, %v2014_v10   ;;  %v3684_v10 = vld [vmem:[#allocation4 + $0x34c] ss:$16 sps:$4 sm:$0xff]  }
  0x88   :  { %2289 = vperm.xlu0 %3492, %v2015_v11   ;;  %v3686_v11 = vld [vmem:[#allocation4 + $0x340] ss:$16 sps:$4 sm:$0xff]  }
  0x8b   :  { %2294 = vperm.xlu1 %3493, %v2016_v13  }
  0x8c   :  { %2299 = vperm.xlu0 %3492, %v2017_v17  }
  0x8d   :  { %1279 = vmatmul.mubr.bf16.gmra.mrb[28].mxu1 %v3572_v27  ;;  %1568 = vmatmul.mubr.bf16.gmra.mrb[28].mxu0 %v3573_v29  ;;  %v2023_v27 = vld [vmem:[%s4215_s2 + $0x1e0] sm:$0xff]  ;;  %v2024_v29 = vld [vmem:[%s4215_s2 + $0x1e8] sm:$0xff] }
  0x8e   :  { %1286 = vmatprep.mubr.bf16.mxu1 %v3574_v30  ;;  %1575 = vmatprep.mubr.bf16.mxu0 %v3576_v32  ;;  %v3621_v30 = vld [vmem:[#allocation4 + $0x1e8] ss:$16 sps:$4 sm:$0xff]   ;;  %v3624_v32 = vld [vmem:[#allocation4 + $0x20c] ss:$16 sps:$4 sm:$0xff]  }
  0x8f   :  { %2304 = vperm.xlu1 %3493, %v2018_v18  }
  0x90   :  { %2309 = vperm.xlu0 %3492, %v2019_v19  }
  0x93   :  { %2314 = vperm.xlu1 %3493, %v2020_v21  }
  0x94   :  { %2319 = vperm.xlu0 %3492, %v2021_v25   ;;  %v3694_v25 = vld [vmem:[#allocation4 + $0x384] ss:$16 sps:$4 sm:$0xff]  }
  0x95   :  { %1287 = vmatmul.mubr.bf16.gmra.mrb[32].mxu1 %v3578_v35  ;;  %1576 = vmatmul.mubr.bf16.gmra.mrb[32].mxu0 %v3579_v38  ;;  %v3626_v35 = vld [vmem:[#allocation4 + $0x200] ss:$16 sps:$4 sm:$0xff]   ;;  %v3630_v38 = vld [vmem:[#allocation4 + $0x22c] ss:$16 sps:$4 sm:$0xff]  }
  0x96   :  { %1294 = vmatprep.mubr.bf16.mxu1 %v3580_v39  ;;  %1583 = vmatprep.mubr.bf16.mxu0 %v3582_v40  ;;  %v3632_v39 = vld [vmem:[#allocation4 + $0x220] ss:$16 sps:$4 sm:$0xff]   ;;  %v3633_v40 = vld [vmem:[#allocation4 + $0x228] ss:$16 sps:$4 sm:$0xff]  }
  0x97   :  { %2324 = vperm.xlu1 %3493, %v2022_v26   ;;  %v4135_v26 = vstv %s4216_s3  ;;  %s3770_s3 = smov [#allocation7]  }
  0x98   :  { %2329 = vperm.xlu0 %3492, %v2023_v27   ;;  %s2930_s28 = sshll.u32 %s3770_s3, 4  ;;  %s2931_s28 = int_to_ptr.vmem [resolvable:$true] %s2930_s28 }
  0x99   :  { %s3740_s29 = scalar_lea.vmem %s2931_s28, 4096  ;;  %p3745_p9 = scmp.lt.s32.totalorder %s2931_s28, %s2931_s28 }
  0x9a   :  { %p3741_p8 = scmp.ne.s32.totalorder %s2931_s28, %s3740_s29  ;;  %p3746_p10 = scmp.lt.s32.totalorder %s3740_s29, %s3740_s29 }
  0x9b   :  { %2334 = vperm.xlu1 %3493, %v2024_v29   ;;  %v3696_v29 = vld [vmem:[#allocation4 + $0x38c] ss:$16 sps:$4 sm:$0xff]  }
  0x9c   :  { %2339 = vperm.xlu0 %3492, %v2025_v33   ;;  %p3747_p11 = por %p3746_p10, %p3745_p9 }
  0x9d   :  { %1295 = vmatmul.mubr.bf16.gmra.mrb[36].mxu1 %v3584_v44  ;;  %1584 = vmatmul.mubr.bf16.gmra.mrb[36].mxu0 %v3585_v46  ;;  %v3639_v44 = vld [vmem:[#allocation4 + $0x248] ss:$16 sps:$4 sm:$0xff]   ;;  %v3642_v46 = vld [vmem:[#allocation4 + $0x26c] ss:$16 sps:$4 sm:$0xff]  }
  0x9e   :  { %1302 = vmatprep.mubr.bf16.mxu1 %v3586_v47  ;;  %1591 = vmatprep.mubr.bf16.mxu0 %v3588_v48  ;;  %v3644_v47 = vld [vmem:[#allocation4 + $0x260] ss:$16 sps:$4 sm:$0xff]   ;;  %v3645_v48 = vld [vmem:[#allocation4 + $0x268] ss:$16 sps:$4 sm:$0xff]   ;;  %p3748_p12 = pnand %p3747_p11, %p3741_p8 }
  0x9f   :  { %2344 = vperm.xlu1 %3493, %v2026_v34   ;;  %v2030_v13 = vpop.permute.xlu0 %2029 }
  0xa3   :  { %v2035_v17 = vpop.permute.xlu0 %2034 }
  0xa5   :  { %1303 = vmatmul.mubr.bf16.gmra.mrb[40].mxu1 %v3590_v52  ;;  %1592 = vmatmul.mubr.bf16.gmra.mrb[40].mxu0 %v3591_v54  ;;  %v3651_v52 = vld [vmem:[#allocation4 + $0x288] ss:$16 sps:$4 sm:$0xff]   ;;  %v3654_v54 = vld [vmem:[#allocation4 + $0x2ac] ss:$16 sps:$4 sm:$0xff]  }
  0xa6   :  { %1310 = vmatprep.mubr.bf16.mxu1 %v3592_v55  ;;  %1599 = vmatprep.mubr.bf16.mxu0 %v3594_v56  ;;  %v3656_v55 = vld [vmem:[#allocation4 + $0x2a0] ss:$16 sps:$4 sm:$0xff]   ;;  %v3657_v56 = vld [vmem:[#allocation4 + $0x2a8] ss:$16 sps:$4 sm:$0xff]  }
  0xad   :  { %1311 = vmatmul.mubr.bf16.gmra.mrb[44].mxu1 %v3596_v60  ;;  %1600 = vmatmul.mubr.bf16.gmra.mrb[44].mxu0 %v3597_v62  ;;  %v3663_v60 = vld [vmem:[#allocation4 + $0x2c8] ss:$16 sps:$4 sm:$0xff]   ;;  %v3666_v62 = vld [vmem:[#allocation4 + $0x2ec] ss:$16 sps:$4 sm:$0xff]  }
  0xae   :  { %1318 = vmatprep.mubr.bf16.mxu1 %v3598_v63  ;;  %1607 = vmatprep.mubr.bf16.mxu0 %v3600_v0  ;;  %v3668_v63 = vld [vmem:[#allocation4 + $0x2e0] ss:$16 sps:$4 sm:$0xff]   ;;  %v3669_v0 = vld [vmem:[#allocation4 + $0x2e8] ss:$16 sps:$4 sm:$0xff]  }
  0xb5   :  { %1319 = vmatmul.mubr.bf16.gmra.mrb[48].mxu1 %v3602_v4  ;;  %1608 = vmatmul.mubr.bf16.gmra.mrb[48].mxu0 %v3603_v6  ;;  %v3675_v4 = vld [vmem:[#allocation4 + $0x308] ss:$16 sps:$4 sm:$0xff]   ;;  %v3678_v6 = vld [vmem:[#allocation4 + $0x32c] ss:$16 sps:$4 sm:$0xff]  }
  0xb6   :  { %1326 = vmatprep.mubr.bf16.mxu1 %v3604_v7  ;;  %1615 = vmatprep.mubr.bf16.mxu0 %v3606_v8  ;;  %v3680_v7 = vld [vmem:[#allocation4 + $0x320] ss:$16 sps:$4 sm:$0xff]   ;;  %v3681_v8 = vld [vmem:[#allocation4 + $0x328] ss:$16 sps:$4 sm:$0xff]  }
  0xbd   :  { %1327 = vmatmul.mubr.bf16.gmra.mrb[52].mxu1 %v3608_v12  ;;  %1616 = vmatmul.mubr.bf16.gmra.mrb[52].mxu0 %v3609_v14  ;;  %v3687_v12 = vld [vmem:[#allocation4 + $0x348] ss:$16 sps:$4 sm:$0xff]   ;;  %v3688_v14 = vld [vmem:[#allocation4 + $0x364] ss:$16 sps:$4 sm:$0xff]  }
  0xbe   :  { %1334 = vmatprep.mubr.bf16.mxu1 %v3610_v15  ;;  %1623 = vmatprep.mubr.bf16.mxu0 %v3612_v16  ;;  %v3690_v15 = vld [vmem:[#allocation4 + $0x36c] ss:$16 sps:$4 sm:$0xff]  }
  0xc5   :  { %1335 = vmatmul.mubr.bf16.gmra.mrb[56].mxu1 %v3614_v20  ;;  %1624 = vmatmul.mubr.bf16.gmra.mrb[56].mxu0 %v3615_v22  ;;  %v3692_v20 = vld [vmem:[#allocation4 + $0x360] ss:$16 sps:$4 sm:$0xff]  }
  0xc6   :  { %1342 = vmatprep.mubr.bf16.mxu1 %v3616_v23  ;;  %1631 = vmatprep.mubr.bf16.mxu0 %v3618_v24  ;;  %v3693_v24 = vld [vmem:[#allocation4 + $0x368] ss:$16 sps:$4 sm:$0xff]  }
  0xcd   :  { %1343 = vmatmul.mubr.bf16.gmra.mrb[60].mxu1 %v3620_v28  ;;  %1632 = vmatmul.mubr.bf16.gmra.mrb[60].mxu0 %v3621_v30 }
  0xce   :  { %1350 = vmatprep.mubr.bf16.mxu1 %v3622_v31  ;;  %1639 = vmatprep.mubr.bf16.mxu0 %v3624_v32 }
  0xd5   :  { %1351 = vmatmul.mubr.bf16.gmra.mrb[64].mxu1 %v3626_v35  ;;  %1640 = vmatmul.mubr.bf16.gmra.mrb[64].mxu0 %v3627_v36  ;;  %v2040_v35 = vpop.permute.xlu1 %2039 }
  0xd6   :  { %1358 = vmatprep.mubr.bf16.mxu1 %v3628_v37  ;;  %1647 = vmatprep.mubr.bf16.mxu0 %v3630_v38 }
  0xdd   :  { %1359 = vmatmul.mubr.bf16.gmra.mrb[68].mxu1 %v3632_v39  ;;  %1648 = vmatmul.mubr.bf16.gmra.mrb[68].mxu0 %v3633_v40  ;;  %v3698_v40 = vld [vmem:[#allocation4 + $0x380] ss:$16 sps:$4 sm:$0xff]  }
  0xde   :  { %1366 = vmatprep.mubr.bf16.mxu1 %v3634_v41  ;;  %1655 = vmatprep.mubr.bf16.mxu0 %v3636_v42 }
  0xe5   :  { %1367 = vmatmul.mubr.bf16.gmra.mrb[72].mxu1 %v3638_v43  ;;  %1656 = vmatmul.mubr.bf16.gmra.mrb[72].mxu0 %v3639_v44 }
  0xe6   :  { %1374 = vmatprep.mubr.bf16.mxu1 %v3640_v45  ;;  %1663 = vmatprep.mubr.bf16.mxu0 %v3642_v46  ;;  %v3699_v46 = vld [vmem:[#allocation4 + $0x388] ss:$16 sps:$4 sm:$0xff]  }
  0xed   :  { %1375 = vmatmul.mubr.bf16.gmra.mrb[76].mxu1 %v3644_v47  ;;  %1664 = vmatmul.mubr.bf16.gmra.mrb[76].mxu0 %v3645_v48  ;;  %v3700_v47 = vld [vmem:[#allocation4 + $0x3a4] ss:$16 sps:$4 sm:$0xff]  }
  0xee   :  { %1382 = vmatprep.mubr.bf16.mxu1 %v3646_v49  ;;  %1671 = vmatprep.mubr.bf16.mxu0 %v3648_v50 }
  0xf5   :  { %1383 = vmatmul.mubr.bf16.gmra.mrb[80].mxu1 %v3650_v51  ;;  %1672 = vmatmul.mubr.bf16.gmra.mrb[80].mxu0 %v3651_v52  ;;  %v3702_v51 = vld [vmem:[#allocation4 + $0x3ac] ss:$16 sps:$4 sm:$0xff]  }
  0xf6   :  { %1390 = vmatprep.mubr.bf16.mxu1 %v3652_v53  ;;  %1679 = vmatprep.mubr.bf16.mxu0 %v3654_v54 }
  0xfd   :  { %1391 = vmatmul.mubr.bf16.gmra.mrb[84].mxu1 %v3656_v55  ;;  %1680 = vmatmul.mubr.bf16.gmra.mrb[84].mxu0 %v3657_v56  ;;  %v2045_v55 = vpop.permute.xlu1 %2044 }
  0xfe   :  { %1398 = vmatprep.mubr.bf16.mxu1 %v3658_v57  ;;  %1687 = vmatprep.mubr.bf16.mxu0 %v3660_v58 }
 0x105   :  { %1399 = vmatmul.mubr.bf16.gmra.mrb[88].mxu1 %v3662_v59  ;;  %1688 = vmatmul.mubr.bf16.gmra.mrb[88].mxu0 %v3663_v60  ;;  %v2050_v59 = vpop.permute.xlu0 %2049 }
 0x106   :  { %1406 = vmatprep.mubr.bf16.mxu1 %v3664_v61  ;;  %1695 = vmatprep.mubr.bf16.mxu0 %v3666_v62 }
 0x10d   :  { %1407 = vmatmul.mubr.bf16.gmra.mrb[92].mxu1 %v3668_v63  ;;  %1696 = vmatmul.mubr.bf16.gmra.mrb[92].mxu0 %v3669_v0  ;;  %v3704_v63 = vld [vmem:[#allocation4 + $0x3a0] ss:$16 sps:$4 sm:$0xff]  }
 0x10e   :  { %1414 = vmatprep.mubr.bf16.mxu1 %v3670_v1  ;;  %1703 = vmatprep.mubr.bf16.mxu0 %v3672_v2 }
 0x115   :  { %1415 = vmatmul.mubr.bf16.gmra.mrb[96].mxu1 %v3674_v3  ;;  %1704 = vmatmul.mubr.bf16.gmra.mrb[96].mxu0 %v3675_v4 }
 0x116   :  { %1422 = vmatprep.mubr.bf16.mxu1 %v3676_v5  ;;  %1711 = vmatprep.mubr.bf16.mxu0 %v3678_v6  ;;  %v3705_v5 = vld [vmem:[#allocation4 + $0x3a8] ss:$16 sps:$4 sm:$0xff]   ;;  %v3706_v6 = vld [vmem:[#allocation4 + $0x3c4] ss:$16 sps:$4 sm:$0xff]  }
 0x11d   :  { %1423 = vmatmul.mubr.bf16.gmra.mrb[100].mxu1 %v3680_v7  ;;  %1712 = vmatmul.mubr.bf16.gmra.mrb[100].mxu0 %v3681_v8 }
 0x11e   :  { %1430 = vmatprep.mubr.bf16.mxu1 %v3682_v9  ;;  %1719 = vmatprep.mubr.bf16.mxu0 %v3684_v10  ;;  %v3708_v10 = vld [vmem:[#allocation4 + $0x3cc] ss:$16 sps:$4 sm:$0xff]  }
 0x125   :  { %1431 = vmatmul.mubr.bf16.gmra.mrb[104].mxu1 %v3686_v11  ;;  %1720 = vmatmul.mubr.bf16.gmra.mrb[104].mxu0 %v3687_v12 }
 0x126   :  { %1438 = vmatprep.mubr.bf16.mxu1 %v3688_v14  ;;  %1727 = vmatprep.mubr.bf16.mxu0 %v3690_v15  ;;  %v2055_v14 = vpop.permute.xlu1 %2054 }
 0x128   :  { %v1224_v16 = vpop.f32.mrb[0].mxu1  ;;  %v1513_v18 = vpop.f32.mrb[0].mxu0 }
 0x129   :  { %v1226_v19 = vpop.f32.mrb[1].mxu1  ;;  %v1514_v21 = vadd.f32 %v1513_v18, %v1224_v16  ;;  %v1515_v22 = vpop.f32.mrb[1].mxu0 }
 0x12a   :  { %v1227_v23 = vpop.f32.mrb[2].mxu1  ;;  %v1516_v27 = vpop.f32.mrb[2].mxu0  ;;  %v3710_v22 = vld [vmem:[#allocation4 + $0x3c0] ss:$16 sps:$4 sm:$0xff]  }
 0x12b   :  { %v1229_v28 = vpop.f32.mrb[3].mxu1  ;;  %v2347_v30 = vmul.f32 %v2030_v13, %v1514_v21  ;;  %v1517_v31 = vadd.f32 %v1516_v27, %v1227_v23  ;;  %v1518_v32 = vpop.f32.mrb[3].mxu0 }
 0x12d   :  { %1439 = vmatmul.mubr.bf16.gmra.mrb[108].mxu1 %v3692_v20  ;;  %v2477_v33 = vmul.f32 %v4135_v26, %v2347_v30  ;;  %v2348_v34 = vmul.f32 %v2035_v17, %v1517_v31  ;;  %1728 = vmatmul.mubr.bf16.gmra.mrb[108].mxu0 %v3693_v24  ;;  %vm2412_vm0 = vcmp.ge.f32.partialorder %v2347_v30, 0.0  ;;  %v2060_v17 = vpop.permute.xlu0 %2059 }
 0x12e   :  { %1446 = vmatprep.mubr.bf16.mxu1 %v3694_v25  ;;  %1735 = vmatprep.mubr.bf16.mxu0 %v3696_v29  ;;  %v3711_v29 = vld [vmem:[#allocation4 + $0x3c8] ss:$16 sps:$4 sm:$0xff]  }
 0x12f   :  { %vm2413_vm1 = vcmp.ge.f32.partialorder %v2348_v34, 0.0  ;;  %v2478_v36 = vmul.f32 %v4135_v26, %v2348_v34  ;;  %v2541_v41 = vsel %vm2412_vm0, %v2347_v30, %v2477_v33  ;;  %v3712_v30 = vld [vmem:[#allocation4 + $0x3e4] ss:$16 sps:$4 sm:$0xff]  }
 0x130   :  { %v1232_v37 = vpop.f32.mrb[4].mxu1  ;;  %v1521_v38 = vpop.f32.mrb[4].mxu0 }
 0x131   :  { %v1234_v39 = vpop.f32.mrb[5].mxu1  ;;  %v2542_v42 = vsel %vm2413_vm1, %v2348_v34, %v2478_v36  ;;  %v1522_v43 = vadd.f32 %v1521_v38, %v1232_v37  ;;  %v1523_v44 = vpop.f32.mrb[5].mxu0  ;;  %v3714_v34 = vld [vmem:[#allocation4 + $0x3ec] ss:$16 sps:$4 sm:$0xff]  }
 0x132   :  { %v1235_v45 = vpop.f32.mrb[6].mxu1  ;;  %v3233_v48 = vpack.c.bf16 %v2542_v42, %v2541_v41  ;;  %v1524_v49 = vpop.f32.mrb[6].mxu0 }
 0x133   :  { %v1237_v50 = vpop.f32.mrb[7].mxu1  ;;  %v2349_v52 = vmul.f32 %v2040_v35, %v1522_v43  ;;  %v1525_v53 = vadd.f32 %v1524_v49, %v1235_v45  ;;  %v1526_v54 = vpop.f32.mrb[7].mxu0 }
 0x134   :  { %3234 = vst [vmem:[#allocation7] sm:$0xff] %v3233_v48   ;;  %v2065_v38 = vpop.permute.xlu1 %2064  ;;  %v2070_v41 = vpop.permute.xlu0 %2069 }
 0x135   :  { %1447 = vmatmul.mubr.bf16.gmra.mrb[112].mxu1 %v3698_v40  ;;  %v2479_v56 = vmul.f32 %v4135_v26, %v2349_v52  ;;  %v2350_v57 = vmul.f32 %v2045_v55, %v1525_v53  ;;  %1736 = vmatmul.mubr.bf16.gmra.mrb[112].mxu0 %v3699_v46  ;;  %vm2414_vm2 = vcmp.ge.f32.partialorder %v2349_v52, 0.0  ;;  %v3716_v46 = vld [vmem:[#allocation4 + $0x3e0] ss:$16 sps:$4 sm:$0xff]  }
 0x136   :  { %1454 = vmatprep.mubr.bf16.mxu1 %v3700_v47  ;;  %1743 = vmatprep.mubr.bf16.mxu0 %v3702_v51 }
 0x137   :  { %vm2415_vm3 = vcmp.ge.f32.partialorder %v2350_v57, 0.0  ;;  %v2480_v58 = vmul.f32 %v4135_v26, %v2350_v57  ;;  %v2543_v0 = vsel %vm2414_vm2, %v2349_v52, %v2479_v56  ;;  %v3717_v52 = vld [vmem:[#allocation4 + $0x3e8] ss:$16 sps:$4 sm:$0xff]  }
 0x138   :  { %v1240_v60 = vpop.f32.mrb[8].mxu1  ;;  %v1529_v61 = vpop.f32.mrb[8].mxu0 }
 0x139   :  { %v1242_v62 = vpop.f32.mrb[9].mxu1  ;;  %v2544_v1 = vsel %vm2415_vm3, %v2350_v57, %v2480_v58  ;;  %v1530_v2 = vadd.f32 %v1529_v61, %v1240_v60  ;;  %v1531_v3 = vpop.f32.mrb[9].mxu0 }
 0x13a   :  { %v1243_v4 = vpop.f32.mrb[10].mxu1  ;;  %v3238_v7 = vpack.c.bf16 %v2544_v1, %v2543_v0  ;;  %v1532_v8 = vpop.f32.mrb[10].mxu0 }
 0x13b   :  { %v1245_v9 = vpop.f32.mrb[11].mxu1  ;;  %v2351_v11 = vmul.f32 %v2050_v59, %v1530_v2  ;;  %v1533_v12 = vadd.f32 %v1532_v8, %v1243_v4  ;;  %v1534_v13 = vpop.f32.mrb[11].mxu0 }
 0x13c   :  { %3390 = vst [vmem:[#allocation7 + $0x8] sm:$0xff] %v3238_v7   ;;  %v2075_v59 = vpop.permute.xlu1 %2074  ;;  %v2080_v62 = vpop.permute.xlu0 %2079 }
 0x13d   :  { %1455 = vmatmul.mubr.bf16.gmra.mrb[116].mxu1 %v3704_v63  ;;  %v2481_v15 = vmul.f32 %v4135_v26, %v2351_v11  ;;  %v2352_v16 = vmul.f32 %v2055_v14, %v1533_v12  ;;  %1744 = vmatmul.mubr.bf16.gmra.mrb[116].mxu0 %v3705_v5  ;;  %vm2416_vm4 = vcmp.ge.f32.partialorder %v2351_v11, 0.0 }
 0x13e   :  { %1462 = vmatprep.mubr.bf16.mxu1 %v3706_v6  ;;  %1751 = vmatprep.mubr.bf16.mxu0 %v3708_v10 }
 0x13f   :  { %vm2417_vm5 = vcmp.ge.f32.partialorder %v2352_v16, 0.0  ;;  %v2482_v18 = vmul.f32 %v4135_v26, %v2352_v16  ;;  %v2545_v23 = vsel %vm2416_vm4, %v2351_v11, %v2481_v15 }
 0x140   :  { %v1248_v19 = vpop.f32.mrb[12].mxu1  ;;  %v1537_v20 = vpop.f32.mrb[12].mxu0 }
 0x141   :  { %v1250_v21 = vpop.f32.mrb[13].mxu1  ;;  %v2546_v24 = vsel %vm2417_vm5, %v2352_v16, %v2482_v18  ;;  %v1538_v25 = vadd.f32 %v1537_v20, %v1248_v19  ;;  %v1539_v27 = vpop.f32.mrb[13].mxu0 }
 0x142   :  { %v1251_v28 = vpop.f32.mrb[14].mxu1  ;;  %v3243_v31 = vpack.c.bf16 %v2546_v24, %v2545_v23  ;;  %v1540_v32 = vpop.f32.mrb[14].mxu0 }
 0x143   :  { %v1253_v33 = vpop.f32.mrb[15].mxu1  ;;  %v2353_v35 = vmul.f32 %v2060_v17, %v1538_v25  ;;  %v1541_v36 = vadd.f32 %v1540_v32, %v1251_v28  ;;  %v1542_v37 = vpop.f32.mrb[15].mxu0 }
 0x144   :  { %3391 = vst [vmem:[#allocation7 + $0x10] sm:$0xff] %v3243_v31   ;;  %v2085_v14 = vpop.permute.xlu1 %2084  ;;  %v2090_v17 = vpop.permute.xlu0 %2089 }
 0x145   :  { %1463 = vmatmul.mubr.bf16.gmra.mrb[120].mxu1 %v3710_v22  ;;  %v2483_v39 = vmul.f32 %v4135_v26, %v2353_v35  ;;  %v2354_v40 = vmul.f32 %v2065_v38, %v1541_v36  ;;  %1752 = vmatmul.mubr.bf16.gmra.mrb[120].mxu0 %v3711_v29  ;;  %vm2418_vm6 = vcmp.ge.f32.partialorder %v2353_v35, 0.0 }
 0x146   :  { %1470 = vmatprep.mubr.bf16.mxu1 %v3712_v30  ;;  %1759 = vmatprep.mubr.bf16.mxu0 %v3714_v34 }
 0x147   :  { %vm2419_vm7 = vcmp.ge.f32.partialorder %v2354_v40, 0.0  ;;  %v2484_v42 = vmul.f32 %v4135_v26, %v2354_v40  ;;  %v2547_v47 = vsel %vm2418_vm6, %v2353_v35, %v2483_v39 }
 0x148   :  { %v1256_v43 = vpop.f32.mrb[16].mxu1  ;;  %v1545_v44 = vpop.f32.mrb[16].mxu0 }
 0x149   :  { %v1258_v45 = vpop.f32.mrb[17].mxu1  ;;  %v2548_v48 = vsel %vm2419_vm7, %v2354_v40, %v2484_v42  ;;  %v1546_v49 = vadd.f32 %v1545_v44, %v1256_v43  ;;  %v1547_v50 = vpop.f32.mrb[17].mxu0 }
 0x14a   :  { %v1259_v51 = vpop.f32.mrb[18].mxu1  ;;  %v3248_v53 = vpack.c.bf16 %v2548_v48, %v2547_v47  ;;  %v1548_v54 = vpop.f32.mrb[18].mxu0 }
 0x14b   :  { %v1261_v55 = vpop.f32.mrb[19].mxu1  ;;  %v2355_v56 = vmul.f32 %v2070_v41, %v1546_v49  ;;  %v1549_v57 = vadd.f32 %v1548_v54, %v1259_v51  ;;  %v1550_v58 = vpop.f32.mrb[19].mxu0 }
 0x14c   :  { %3392 = vst [vmem:[#allocation7 + $0x18] sm:$0xff] %v3248_v53   ;;  %v2095_v34 = vpop.permute.xlu1 %2094  ;;  %v2100_v37 = vpop.permute.xlu0 %2099 }
 0x14d   :  { %1471 = vmatmul.mubr.bf16.gmra.mrb[124].mxu1 %v3716_v46  ;;  %v2485_v60 = vmul.f32 %v4135_v26, %v2355_v56  ;;  %v2356_v61 = vmul.f32 %v2075_v59, %v1549_v57  ;;  %1760 = vmatmul.mubr.bf16.gmra.mrb[124].mxu0 %v3717_v52  ;;  %vm2420_vm8 = vcmp.ge.f32.partialorder %v2355_v56, 0.0 }
 0x14f   :  { %vm2421_vm9 = vcmp.ge.f32.partialorder %v2356_v61, 0.0  ;;  %v2486_v63 = vmul.f32 %v4135_v26, %v2356_v61  ;;  %v2549_v3 = vsel %vm2420_vm8, %v2355_v56, %v2485_v60 }
 0x150   :  { %v1264_v0 = vpop.f32.mrb[20].mxu1  ;;  %v1553_v1 = vpop.f32.mrb[20].mxu0 }
 0x151   :  { %v1266_v2 = vpop.f32.mrb[21].mxu1  ;;  %v2550_v4 = vsel %vm2421_vm9, %v2356_v61, %v2486_v63  ;;  %v1554_v5 = vadd.f32 %v1553_v1, %v1264_v0  ;;  %v1555_v6 = vpop.f32.mrb[21].mxu0 }
 0x152   :  { %v1267_v7 = vpop.f32.mrb[22].mxu1  ;;  %v3253_v8 = vpack.c.bf16 %v2550_v4, %v2549_v3  ;;  %v1556_v9 = vpop.f32.mrb[22].mxu0 }
 0x153   :  { %v1269_v10 = vpop.f32.mrb[23].mxu1  ;;  %v2357_v11 = vmul.f32 %v2080_v62, %v1554_v5  ;;  %v1557_v12 = vadd.f32 %v1556_v9, %v1267_v7  ;;  %v1558_v13 = vpop.f32.mrb[23].mxu0 }
 0x154   :  { %3393 = vst [vmem:[#allocation7 + $0x20] sm:$0xff] %v3253_v8   ;;  %v2105_v53 = vpop.permute.xlu1 %2104  ;;  %v2110_v56 = vpop.permute.xlu0 %2109 }
 0x155   :  { %v2487_v15 = vmul.f32 %v4135_v26, %v2357_v11  ;;  %v2358_v16 = vmul.f32 %v2085_v14, %v1557_v12  ;;  %vm2422_vm10 = vcmp.ge.f32.partialorder %v2357_v11, 0.0 }
 0x157   :  { %vm2423_vm11 = vcmp.ge.f32.partialorder %v2358_v16, 0.0  ;;  %v2488_v18 = vmul.f32 %v4135_v26, %v2358_v16  ;;  %v2551_v22 = vsel %vm2422_vm10, %v2357_v11, %v2487_v15 }
 0x158   :  { %v1272_v19 = vpop.f32.mrb[24].mxu1  ;;  %v1561_v20 = vpop.f32.mrb[24].mxu0 }
 0x159   :  { %v1274_v21 = vpop.f32.mrb[25].mxu1  ;;  %v2552_v23 = vsel %vm2423_vm11, %v2358_v16, %v2488_v18  ;;  %v1562_v24 = vadd.f32 %v1561_v20, %v1272_v19  ;;  %v1563_v25 = vpop.f32.mrb[25].mxu0 }
 0x15a   :  { %v1275_v27 = vpop.f32.mrb[26].mxu1  ;;  %v3258_v28 = vpack.c.bf16 %v2552_v23, %v2551_v22  ;;  %v1564_v29 = vpop.f32.mrb[26].mxu0 }
 0x15b   :  { %v1277_v30 = vpop.f32.mrb[27].mxu1  ;;  %v2359_v31 = vmul.f32 %v2090_v17, %v1562_v24  ;;  %v1565_v32 = vadd.f32 %v1564_v29, %v1275_v27  ;;  %v1566_v33 = vpop.f32.mrb[27].mxu0 }
 0x15c   :  { %3394 = vst [vmem:[#allocation7 + $0x28] sm:$0xff] %v3258_v28   ;;  %v2115_v8 = vpop.permute.xlu1 %2114  ;;  %v2120_v11 = vpop.permute.xlu0 %2119 }
 0x15d   :  { %v2489_v35 = vmul.f32 %v4135_v26, %v2359_v31  ;;  %v2360_v36 = vmul.f32 %v2095_v34, %v1565_v32  ;;  %vm2424_vm12 = vcmp.ge.f32.partialorder %v2359_v31, 0.0 }
 0x15f   :  { %vm2425_vm13 = vcmp.ge.f32.partialorder %v2360_v36, 0.0  ;;  %v2490_v38 = vmul.f32 %v4135_v26, %v2360_v36  ;;  %v2553_v42 = vsel %vm2424_vm12, %v2359_v31, %v2489_v35 }
 0x160   :  { %v1280_v39 = vpop.f32.mrb[28].mxu1  ;;  %v1569_v40 = vpop.f32.mrb[28].mxu0 }
 0x161   :  { %v1282_v41 = vpop.f32.mrb[29].mxu1  ;;  %v2554_v43 = vsel %vm2425_vm13, %v2360_v36, %v2490_v38  ;;  %v1570_v44 = vadd.f32 %v1569_v40, %v1280_v39  ;;  %v1571_v45 = vpop.f32.mrb[29].mxu0 }
 0x162   :  { %v1283_v46 = vpop.f32.mrb[30].mxu1  ;;  %v3263_v47 = vpack.c.bf16 %v2554_v43, %v2553_v42  ;;  %v1572_v48 = vpop.f32.mrb[30].mxu0 }
 0x163   :  { %v1285_v49 = vpop.f32.mrb[31].mxu1  ;;  %v2361_v50 = vmul.f32 %v2100_v37, %v1570_v44  ;;  %v1573_v51 = vadd.f32 %v1572_v48, %v1283_v46  ;;  %v1574_v52 = vpop.f32.mrb[31].mxu0 }
 0x164   :  { %3395 = vst [vmem:[#allocation7 + $0x30] sm:$0xff] %v3263_v47   ;;  %v2125_v28 = vpop.permute.xlu1 %2124  ;;  %v2130_v31 = vpop.permute.xlu0 %2129 }
 0x165   :  { %v2491_v54 = vmul.f32 %v4135_v26, %v2361_v50  ;;  %v2362_v55 = vmul.f32 %v2105_v53, %v1573_v51  ;;  %vm2426_vm14 = vcmp.ge.f32.partialorder %v2361_v50, 0.0 }
 0x167   :  { %vm2427_vm15 = vcmp.ge.f32.partialorder %v2362_v55, 0.0  ;;  %v2492_v57 = vmul.f32 %v4135_v26, %v2362_v55  ;;  %v2555_v61 = vsel %vm2426_vm14, %v2361_v50, %v2491_v54 }
 0x168   :  { %v1288_v58 = vpop.f32.mrb[32].mxu1  ;;  %v1577_v59 = vpop.f32.mrb[32].mxu0 }
 0x169   :  { %v1290_v60 = vpop.f32.mrb[33].mxu1  ;;  %v2556_v62 = vsel %vm2427_vm15, %v2362_v55, %v2492_v57  ;;  %v1578_v63 = vadd.f32 %v1577_v59, %v1288_v58  ;;  %v1579_v0 = vpop.f32.mrb[33].mxu0 }
 0x16a   :  { %v1291_v1 = vpop.f32.mrb[34].mxu1  ;;  %v3268_v2 = vpack.c.bf16 %v2556_v62, %v2555_v61  ;;  %v1580_v3 = vpop.f32.mrb[34].mxu0 }
 0x16b   :  { %v1293_v4 = vpop.f32.mrb[35].mxu1  ;;  %v2363_v5 = vmul.f32 %v2110_v56, %v1578_v63  ;;  %v1581_v6 = vadd.f32 %v1580_v3, %v1291_v1  ;;  %v1582_v7 = vpop.f32.mrb[35].mxu0 }
 0x16c   :  { %3396 = vst [vmem:[#allocation7 + $0x38] sm:$0xff] %v3268_v2   ;;  %v2135_v47 = vpop.permute.xlu1 %2134  ;;  %v2140_v50 = vpop.permute.xlu0 %2139 }
 0x16d   :  { %v2493_v9 = vmul.f32 %v4135_v26, %v2363_v5  ;;  %v2364_v10 = vmul.f32 %v2115_v8, %v1581_v6  ;;  %vm2428_vm0 = vcmp.ge.f32.partialorder %v2363_v5, 0.0 }
 0x16f   :  { %vm2429_vm1 = vcmp.ge.f32.partialorder %v2364_v10, 0.0  ;;  %v2494_v12 = vmul.f32 %v4135_v26, %v2364_v10  ;;  %v2557_v16 = vsel %vm2428_vm0, %v2363_v5, %v2493_v9 }
 0x170   :  { %v1296_v13 = vpop.f32.mrb[36].mxu1  ;;  %v1585_v14 = vpop.f32.mrb[36].mxu0 }
 0x171   :  { %v1298_v15 = vpop.f32.mrb[37].mxu1  ;;  %v2558_v17 = vsel %vm2429_vm1, %v2364_v10, %v2494_v12  ;;  %v1586_v18 = vadd.f32 %v1585_v14, %v1296_v13  ;;  %v1587_v19 = vpop.f32.mrb[37].mxu0 }
 0x172   :  { %v1299_v20 = vpop.f32.mrb[38].mxu1  ;;  %v3273_v21 = vpack.c.bf16 %v2558_v17, %v2557_v16  ;;  %v1588_v22 = vpop.f32.mrb[38].mxu0 }
 0x173   :  { %v1301_v23 = vpop.f32.mrb[39].mxu1  ;;  %v2365_v24 = vmul.f32 %v2120_v11, %v1586_v18  ;;  %v1589_v25 = vadd.f32 %v1588_v22, %v1299_v20  ;;  %v1590_v27 = vpop.f32.mrb[39].mxu0 }
 0x174   :  { %3397 = vst [vmem:[#allocation7 + $0x40] sm:$0xff] %v3273_v21   ;;  %v2145_v2 = vpop.permute.xlu1 %2144  ;;  %v2150_v5 = vpop.permute.xlu0 %2149 }
 0x175   :  { %v2495_v29 = vmul.f32 %v4135_v26, %v2365_v24  ;;  %v2366_v30 = vmul.f32 %v2125_v28, %v1589_v25  ;;  %vm2430_vm2 = vcmp.ge.f32.partialorder %v2365_v24, 0.0 }
 0x177   :  { %vm2431_vm3 = vcmp.ge.f32.partialorder %v2366_v30, 0.0  ;;  %v2496_v32 = vmul.f32 %v4135_v26, %v2366_v30  ;;  %v2559_v36 = vsel %vm2430_vm2, %v2365_v24, %v2495_v29 }
 0x178   :  { %v1304_v33 = vpop.f32.mrb[40].mxu1  ;;  %v1593_v34 = vpop.f32.mrb[40].mxu0 }
 0x179   :  { %v1306_v35 = vpop.f32.mrb[41].mxu1  ;;  %v2560_v37 = vsel %vm2431_vm3, %v2366_v30, %v2496_v32  ;;  %v1594_v38 = vadd.f32 %v1593_v34, %v1304_v33  ;;  %v1595_v39 = vpop.f32.mrb[41].mxu0 }
 0x17a   :  { %v1307_v40 = vpop.f32.mrb[42].mxu1  ;;  %v3278_v41 = vpack.c.bf16 %v2560_v37, %v2559_v36  ;;  %v1596_v42 = vpop.f32.mrb[42].mxu0 }
 0x17b   :  { %v1309_v43 = vpop.f32.mrb[43].mxu1  ;;  %v2367_v44 = vmul.f32 %v2130_v31, %v1594_v38  ;;  %v1597_v45 = vadd.f32 %v1596_v42, %v1307_v40  ;;  %v1598_v46 = vpop.f32.mrb[43].mxu0 }
 0x17c   :  { %3398 = vst [vmem:[#allocation7 + $0x48] sm:$0xff] %v3278_v41   ;;  %v2155_v21 = vpop.permute.xlu1 %2154  ;;  %v2160_v24 = vpop.permute.xlu0 %2159 }
 0x17d   :  { %v2497_v48 = vmul.f32 %v4135_v26, %v2367_v44  ;;  %v2368_v49 = vmul.f32 %v2135_v47, %v1597_v45  ;;  %vm2432_vm4 = vcmp.ge.f32.partialorder %v2367_v44, 0.0 }
 0x17f   :  { %vm2433_vm5 = vcmp.ge.f32.partialorder %v2368_v49, 0.0  ;;  %v2498_v51 = vmul.f32 %v4135_v26, %v2368_v49  ;;  %v2561_v55 = vsel %vm2432_vm4, %v2367_v44, %v2497_v48 }
 0x180   :  { %v1312_v52 = vpop.f32.mrb[44].mxu1  ;;  %v1601_v53 = vpop.f32.mrb[44].mxu0 }
 0x181   :  { %v1314_v54 = vpop.f32.mrb[45].mxu1  ;;  %v2562_v56 = vsel %vm2433_vm5, %v2368_v49, %v2498_v51  ;;  %v1602_v57 = vadd.f32 %v1601_v53, %v1312_v52  ;;  %v1603_v58 = vpop.f32.mrb[45].mxu0 }
 0x182   :  { %v1315_v59 = vpop.f32.mrb[46].mxu1  ;;  %v3283_v60 = vpack.c.bf16 %v2562_v56, %v2561_v55  ;;  %v1604_v61 = vpop.f32.mrb[46].mxu0 }
 0x183   :  { %v1317_v62 = vpop.f32.mrb[47].mxu1  ;;  %v2369_v63 = vmul.f32 %v2140_v50, %v1602_v57  ;;  %v1605_v0 = vadd.f32 %v1604_v61, %v1315_v59  ;;  %v1606_v1 = vpop.f32.mrb[47].mxu0 }
 0x184   :  { %3399 = vst [vmem:[#allocation7 + $0x50] sm:$0xff] %v3283_v60   ;;  %v2165_v41 = vpop.permute.xlu1 %2164  ;;  %v2170_v44 = vpop.permute.xlu0 %2169 }
 0x185   :  { %v2499_v3 = vmul.f32 %v4135_v26, %v2369_v63  ;;  %v2370_v4 = vmul.f32 %v2145_v2, %v1605_v0  ;;  %vm2434_vm6 = vcmp.ge.f32.partialorder %v2369_v63, 0.0 }
 0x187   :  { %vm2435_vm7 = vcmp.ge.f32.partialorder %v2370_v4, 0.0  ;;  %v2500_v6 = vmul.f32 %v4135_v26, %v2370_v4  ;;  %v2563_v10 = vsel %vm2434_vm6, %v2369_v63, %v2499_v3 }
 0x188   :  { %v1320_v7 = vpop.f32.mrb[48].mxu1  ;;  %v1609_v8 = vpop.f32.mrb[48].mxu0 }
 0x189   :  { %v1322_v9 = vpop.f32.mrb[49].mxu1  ;;  %v2564_v11 = vsel %vm2435_vm7, %v2370_v4, %v2500_v6  ;;  %v1610_v12 = vadd.f32 %v1609_v8, %v1320_v7  ;;  %v1611_v13 = vpop.f32.mrb[49].mxu0 }
 0x18a   :  { %v1323_v14 = vpop.f32.mrb[50].mxu1  ;;  %v3288_v15 = vpack.c.bf16 %v2564_v11, %v2563_v10  ;;  %v1612_v16 = vpop.f32.mrb[50].mxu0 }
 0x18b   :  { %v1325_v17 = vpop.f32.mrb[51].mxu1  ;;  %v2371_v18 = vmul.f32 %v2150_v5, %v1610_v12  ;;  %v1613_v19 = vadd.f32 %v1612_v16, %v1323_v14  ;;  %v1614_v20 = vpop.f32.mrb[51].mxu0 }
 0x18c   :  { %3400 = vst [vmem:[#allocation7 + $0x58] sm:$0xff] %v3288_v15   ;;  %v2175_v60 = vpop.permute.xlu1 %2174  ;;  %v2180_v63 = vpop.permute.xlu0 %2179 }
 0x18d   :  { %v2501_v22 = vmul.f32 %v4135_v26, %v2371_v18  ;;  %v2372_v23 = vmul.f32 %v2155_v21, %v1613_v19  ;;  %vm2436_vm8 = vcmp.ge.f32.partialorder %v2371_v18, 0.0 }
 0x18f   :  { %vm2437_vm9 = vcmp.ge.f32.partialorder %v2372_v23, 0.0  ;;  %v2502_v25 = vmul.f32 %v4135_v26, %v2372_v23  ;;  %v2565_v30 = vsel %vm2436_vm8, %v2371_v18, %v2501_v22 }
 0x190   :  { %v1328_v27 = vpop.f32.mrb[52].mxu1  ;;  %v1617_v28 = vpop.f32.mrb[52].mxu0 }
 0x191   :  { %v1330_v29 = vpop.f32.mrb[53].mxu1  ;;  %v2566_v31 = vsel %vm2437_vm9, %v2372_v23, %v2502_v25  ;;  %v1618_v32 = vadd.f32 %v1617_v28, %v1328_v27  ;;  %v1619_v33 = vpop.f32.mrb[53].mxu0 }
 0x192   :  { %v1331_v34 = vpop.f32.mrb[54].mxu1  ;;  %v3293_v35 = vpack.c.bf16 %v2566_v31, %v2565_v30  ;;  %v1620_v36 = vpop.f32.mrb[54].mxu0 }
 0x193   :  { %v1333_v37 = vpop.f32.mrb[55].mxu1  ;;  %v2373_v38 = vmul.f32 %v2160_v24, %v1618_v32  ;;  %v1621_v39 = vadd.f32 %v1620_v36, %v1331_v34  ;;  %v1622_v40 = vpop.f32.mrb[55].mxu0 }
 0x194   :  { %3401 = vst [vmem:[#allocation7 + $0x60] sm:$0xff] %v3293_v35   ;;  %v2185_v15 = vpop.permute.xlu1 %2184  ;;  %v2190_v18 = vpop.permute.xlu0 %2189 }
 0x195   :  { %v2503_v42 = vmul.f32 %v4135_v26, %v2373_v38  ;;  %v2374_v43 = vmul.f32 %v2165_v41, %v1621_v39  ;;  %vm2438_vm10 = vcmp.ge.f32.partialorder %v2373_v38, 0.0 }
 0x197   :  { %vm2439_vm11 = vcmp.ge.f32.partialorder %v2374_v43, 0.0  ;;  %v2504_v45 = vmul.f32 %v4135_v26, %v2374_v43  ;;  %v2567_v49 = vsel %vm2438_vm10, %v2373_v38, %v2503_v42 }
 0x198   :  { %v1336_v46 = vpop.f32.mrb[56].mxu1  ;;  %v1625_v47 = vpop.f32.mrb[56].mxu0 }
 0x199   :  { %v1338_v48 = vpop.f32.mrb[57].mxu1  ;;  %v2568_v50 = vsel %vm2439_vm11, %v2374_v43, %v2504_v45  ;;  %v1626_v51 = vadd.f32 %v1625_v47, %v1336_v46  ;;  %v1627_v52 = vpop.f32.mrb[57].mxu0 }
 0x19a   :  { %v1339_v53 = vpop.f32.mrb[58].mxu1  ;;  %v3298_v54 = vpack.c.bf16 %v2568_v50, %v2567_v49  ;;  %v1628_v55 = vpop.f32.mrb[58].mxu0 }
 0x19b   :  { %v1341_v56 = vpop.f32.mrb[59].mxu1  ;;  %v2375_v57 = vmul.f32 %v2170_v44, %v1626_v51  ;;  %v1629_v58 = vadd.f32 %v1628_v55, %v1339_v53  ;;  %v1630_v59 = vpop.f32.mrb[59].mxu0 }
 0x19c   :  { %3402 = vst [vmem:[#allocation7 + $0x68] sm:$0xff] %v3298_v54   ;;  %v2195_v35 = vpop.permute.xlu1 %2194  ;;  %v2200_v38 = vpop.permute.xlu0 %2199 }
 0x19d   :  { %v2505_v61 = vmul.f32 %v4135_v26, %v2375_v57  ;;  %v2376_v62 = vmul.f32 %v2175_v60, %v1629_v58  ;;  %vm2440_vm12 = vcmp.ge.f32.partialorder %v2375_v57, 0.0 }
 0x19f   :  { %vm2441_vm13 = vcmp.ge.f32.partialorder %v2376_v62, 0.0  ;;  %v2506_v0 = vmul.f32 %v4135_v26, %v2376_v62  ;;  %v2569_v4 = vsel %vm2440_vm12, %v2375_v57, %v2505_v61 }
 0x1a0   :  { %v1344_v1 = vpop.f32.mrb[60].mxu1  ;;  %v1633_v2 = vpop.f32.mrb[60].mxu0 }
 0x1a1   :  { %v1346_v3 = vpop.f32.mrb[61].mxu1  ;;  %v2570_v5 = vsel %vm2441_vm13, %v2376_v62, %v2506_v0  ;;  %v1634_v6 = vadd.f32 %v1633_v2, %v1344_v1  ;;  %v1635_v7 = vpop.f32.mrb[61].mxu0 }
 0x1a2   :  { %v1347_v8 = vpop.f32.mrb[62].mxu1  ;;  %v3303_v9 = vpack.c.bf16 %v2570_v5, %v2569_v4  ;;  %v1636_v10 = vpop.f32.mrb[62].mxu0 }
 0x1a3   :  { %v1349_v11 = vpop.f32.mrb[63].mxu1  ;;  %v2377_v12 = vmul.f32 %v2180_v63, %v1634_v6  ;;  %v1637_v13 = vadd.f32 %v1636_v10, %v1347_v8  ;;  %v1638_v14 = vpop.f32.mrb[63].mxu0 }
 0x1a4   :  { %3403 = vst [vmem:[#allocation7 + $0x70] sm:$0xff] %v3303_v9   ;;  %v2205_v54 = vpop.permute.xlu1 %2204  ;;  %v2210_v57 = vpop.permute.xlu0 %2209 }
 0x1a5   :  { %v2507_v16 = vmul.f32 %v4135_v26, %v2377_v12  ;;  %v2378_v17 = vmul.f32 %v2185_v15, %v1637_v13  ;;  %vm2442_vm14 = vcmp.ge.f32.partialorder %v2377_v12, 0.0 }
 0x1a7   :  { %vm2443_vm15 = vcmp.ge.f32.partialorder %v2378_v17, 0.0  ;;  %v2508_v19 = vmul.f32 %v4135_v26, %v2378_v17  ;;  %v2571_v23 = vsel %vm2442_vm14, %v2377_v12, %v2507_v16 }
 0x1a8   :  { %v1352_v20 = vpop.f32.mrb[64].mxu1  ;;  %v1641_v21 = vpop.f32.mrb[64].mxu0 }
 0x1a9   :  { %v1354_v22 = vpop.f32.mrb[65].mxu1  ;;  %v2572_v24 = vsel %vm2443_vm15, %v2378_v17, %v2508_v19  ;;  %v1642_v25 = vadd.f32 %v1641_v21, %v1352_v20  ;;  %v1643_v27 = vpop.f32.mrb[65].mxu0 }
 0x1aa   :  { %v1355_v28 = vpop.f32.mrb[66].mxu1  ;;  %v3308_v29 = vpack.c.bf16 %v2572_v24, %v2571_v23  ;;  %v1644_v30 = vpop.f32.mrb[66].mxu0 }
 0x1ab   :  { %v1357_v31 = vpop.f32.mrb[67].mxu1  ;;  %v2379_v32 = vmul.f32 %v2190_v18, %v1642_v25  ;;  %v1645_v33 = vadd.f32 %v1644_v30, %v1355_v28  ;;  %v1646_v34 = vpop.f32.mrb[67].mxu0 }
 0x1ac   :  { %3404 = vst [vmem:[#allocation7 + $0x78] sm:$0xff] %v3308_v29   ;;  %v2215_v9 = vpop.permute.xlu1 %2214  ;;  %v2220_v12 = vpop.permute.xlu0 %2219 }
 0x1ad   :  { %v2509_v36 = vmul.f32 %v4135_v26, %v2379_v32  ;;  %v2380_v37 = vmul.f32 %v2195_v35, %v1645_v33  ;;  %vm2444_vm0 = vcmp.ge.f32.partialorder %v2379_v32, 0.0 }
 0x1af   :  { %vm2445_vm1 = vcmp.ge.f32.partialorder %v2380_v37, 0.0  ;;  %v2510_v39 = vmul.f32 %v4135_v26, %v2380_v37  ;;  %v2573_v43 = vsel %vm2444_vm0, %v2379_v32, %v2509_v36 }
 0x1b0   :  { %v1360_v40 = vpop.f32.mrb[68].mxu1  ;;  %v1649_v41 = vpop.f32.mrb[68].mxu0 }
 0x1b1   :  { %v1362_v42 = vpop.f32.mrb[69].mxu1  ;;  %v2574_v44 = vsel %vm2445_vm1, %v2380_v37, %v2510_v39  ;;  %v1650_v45 = vadd.f32 %v1649_v41, %v1360_v40  ;;  %v1651_v46 = vpop.f32.mrb[69].mxu0 }
 0x1b2   :  { %v1363_v47 = vpop.f32.mrb[70].mxu1  ;;  %v3313_v48 = vpack.c.bf16 %v2574_v44, %v2573_v43  ;;  %v1652_v49 = vpop.f32.mrb[70].mxu0 }
 0x1b3   :  { %v1365_v50 = vpop.f32.mrb[71].mxu1  ;;  %v2381_v51 = vmul.f32 %v2200_v38, %v1650_v45  ;;  %v1653_v52 = vadd.f32 %v1652_v49, %v1363_v47  ;;  %v1654_v53 = vpop.f32.mrb[71].mxu0 }
 0x1b4   :  { %3405 = vst [vmem:[#allocation7 + $0x80] sm:$0xff] %v3313_v48   ;;  %v2225_v29 = vpop.permute.xlu1 %2224  ;;  %v2230_v32 = vpop.permute.xlu0 %2229 }
 0x1b5   :  { %v2511_v55 = vmul.f32 %v4135_v26, %v2381_v51  ;;  %v2382_v56 = vmul.f32 %v2205_v54, %v1653_v52  ;;  %vm2446_vm2 = vcmp.ge.f32.partialorder %v2381_v51, 0.0 }
 0x1b7   :  { %vm2447_vm3 = vcmp.ge.f32.partialorder %v2382_v56, 0.0  ;;  %v2512_v58 = vmul.f32 %v4135_v26, %v2382_v56  ;;  %v2575_v62 = vsel %vm2446_vm2, %v2381_v51, %v2511_v55 }
 0x1b8   :  { %v1368_v59 = vpop.f32.mrb[72].mxu1  ;;  %v1657_v60 = vpop.f32.mrb[72].mxu0 }
 0x1b9   :  { %v1370_v61 = vpop.f32.mrb[73].mxu1  ;;  %v2576_v63 = vsel %vm2447_vm3, %v2382_v56, %v2512_v58  ;;  %v1658_v0 = vadd.f32 %v1657_v60, %v1368_v59  ;;  %v1659_v1 = vpop.f32.mrb[73].mxu0 }
 0x1ba   :  { %v1371_v2 = vpop.f32.mrb[74].mxu1  ;;  %v3318_v3 = vpack.c.bf16 %v2576_v63, %v2575_v62  ;;  %v1660_v4 = vpop.f32.mrb[74].mxu0 }
 0x1bb   :  { %v1373_v5 = vpop.f32.mrb[75].mxu1  ;;  %v2383_v6 = vmul.f32 %v2210_v57, %v1658_v0  ;;  %v1661_v7 = vadd.f32 %v1660_v4, %v1371_v2  ;;  %v1662_v8 = vpop.f32.mrb[75].mxu0 }
 0x1bc   :  { %3406 = vst [vmem:[#allocation7 + $0x88] sm:$0xff] %v3318_v3   ;;  %v2235_v48 = vpop.permute.xlu1 %2234  ;;  %v2240_v51 = vpop.permute.xlu0 %2239 }
 0x1bd   :  { %v2513_v10 = vmul.f32 %v4135_v26, %v2383_v6  ;;  %v2384_v11 = vmul.f32 %v2215_v9, %v1661_v7  ;;  %vm2448_vm4 = vcmp.ge.f32.partialorder %v2383_v6, 0.0 }
 0x1bf   :  { %vm2449_vm5 = vcmp.ge.f32.partialorder %v2384_v11, 0.0  ;;  %v2514_v13 = vmul.f32 %v4135_v26, %v2384_v11  ;;  %v2577_v17 = vsel %vm2448_vm4, %v2383_v6, %v2513_v10 }
 0x1c0   :  { %v1376_v14 = vpop.f32.mrb[76].mxu1  ;;  %v1665_v15 = vpop.f32.mrb[76].mxu0 }
 0x1c1   :  { %v1378_v16 = vpop.f32.mrb[77].mxu1  ;;  %v2578_v18 = vsel %vm2449_vm5, %v2384_v11, %v2514_v13  ;;  %v1666_v19 = vadd.f32 %v1665_v15, %v1376_v14  ;;  %v1667_v20 = vpop.f32.mrb[77].mxu0 }
 0x1c2   :  { %v1379_v21 = vpop.f32.mrb[78].mxu1  ;;  %v3323_v22 = vpack.c.bf16 %v2578_v18, %v2577_v17  ;;  %v1668_v23 = vpop.f32.mrb[78].mxu0 }
 0x1c3   :  { %v1381_v24 = vpop.f32.mrb[79].mxu1  ;;  %v2385_v25 = vmul.f32 %v2220_v12, %v1666_v19  ;;  %v1669_v27 = vadd.f32 %v1668_v23, %v1379_v21  ;;  %v1670_v28 = vpop.f32.mrb[79].mxu0 }
 0x1c4   :  { %3407 = vst [vmem:[#allocation7 + $0x90] sm:$0xff] %v3323_v22   ;;  %v2245_v3 = vpop.permute.xlu1 %2244  ;;  %v2250_v6 = vpop.permute.xlu0 %2249 }
 0x1c5   :  { %v2515_v30 = vmul.f32 %v4135_v26, %v2385_v25  ;;  %v2386_v31 = vmul.f32 %v2225_v29, %v1669_v27  ;;  %vm2450_vm6 = vcmp.ge.f32.partialorder %v2385_v25, 0.0 }
 0x1c7   :  { %vm2451_vm7 = vcmp.ge.f32.partialorder %v2386_v31, 0.0  ;;  %v2516_v33 = vmul.f32 %v4135_v26, %v2386_v31  ;;  %v2579_v37 = vsel %vm2450_vm6, %v2385_v25, %v2515_v30 }
 0x1c8   :  { %v1384_v34 = vpop.f32.mrb[80].mxu1  ;;  %v1673_v35 = vpop.f32.mrb[80].mxu0 }
 0x1c9   :  { %v1386_v36 = vpop.f32.mrb[81].mxu1  ;;  %v2580_v38 = vsel %vm2451_vm7, %v2386_v31, %v2516_v33  ;;  %v1674_v39 = vadd.f32 %v1673_v35, %v1384_v34  ;;  %v1675_v40 = vpop.f32.mrb[81].mxu0 }
 0x1ca   :  { %v1387_v41 = vpop.f32.mrb[82].mxu1  ;;  %v3328_v42 = vpack.c.bf16 %v2580_v38, %v2579_v37  ;;  %v1676_v43 = vpop.f32.mrb[82].mxu0 }
 0x1cb   :  { %v1389_v44 = vpop.f32.mrb[83].mxu1  ;;  %v2387_v45 = vmul.f32 %v2230_v32, %v1674_v39  ;;  %v1677_v46 = vadd.f32 %v1676_v43, %v1387_v41  ;;  %v1678_v47 = vpop.f32.mrb[83].mxu0 }
 0x1cc   :  { %3408 = vst [vmem:[#allocation7 + $0x98] sm:$0xff] %v3328_v42   ;;  %v2255_v22 = vpop.permute.xlu1 %2254  ;;  %v2260_v25 = vpop.permute.xlu0 %2259 }
 0x1cd   :  { %v2517_v49 = vmul.f32 %v4135_v26, %v2387_v45  ;;  %v2388_v50 = vmul.f32 %v2235_v48, %v1677_v46  ;;  %vm2452_vm8 = vcmp.ge.f32.partialorder %v2387_v45, 0.0 }
 0x1cf   :  { %vm2453_vm9 = vcmp.ge.f32.partialorder %v2388_v50, 0.0  ;;  %v2518_v52 = vmul.f32 %v4135_v26, %v2388_v50  ;;  %v2581_v56 = vsel %vm2452_vm8, %v2387_v45, %v2517_v49 }
 0x1d0   :  { %v1392_v53 = vpop.f32.mrb[84].mxu1  ;;  %v1681_v54 = vpop.f32.mrb[84].mxu0 }
 0x1d1   :  { %v1394_v55 = vpop.f32.mrb[85].mxu1  ;;  %v2582_v57 = vsel %vm2453_vm9, %v2388_v50, %v2518_v52  ;;  %v1682_v58 = vadd.f32 %v1681_v54, %v1392_v53  ;;  %v1683_v59 = vpop.f32.mrb[85].mxu0 }
 0x1d2   :  { %v1395_v60 = vpop.f32.mrb[86].mxu1  ;;  %v3333_v61 = vpack.c.bf16 %v2582_v57, %v2581_v56  ;;  %v1684_v62 = vpop.f32.mrb[86].mxu0 }
 0x1d3   :  { %v1397_v63 = vpop.f32.mrb[87].mxu1  ;;  %v2389_v0 = vmul.f32 %v2240_v51, %v1682_v58  ;;  %v1685_v1 = vadd.f32 %v1684_v62, %v1395_v60  ;;  %v1686_v2 = vpop.f32.mrb[87].mxu0 }
 0x1d4   :  { %3409 = vst [vmem:[#allocation7 + $0xa0] sm:$0xff] %v3333_v61   ;;  %v2265_v42 = vpop.permute.xlu1 %2264  ;;  %v2270_v45 = vpop.permute.xlu0 %2269 }
 0x1d5   :  { %v2519_v4 = vmul.f32 %v4135_v26, %v2389_v0  ;;  %v2390_v5 = vmul.f32 %v2245_v3, %v1685_v1  ;;  %vm2454_vm10 = vcmp.ge.f32.partialorder %v2389_v0, 0.0 }
 0x1d7   :  { %vm2455_vm11 = vcmp.ge.f32.partialorder %v2390_v5, 0.0  ;;  %v2520_v7 = vmul.f32 %v4135_v26, %v2390_v5  ;;  %v2583_v11 = vsel %vm2454_vm10, %v2389_v0, %v2519_v4 }
 0x1d8   :  { %v1400_v8 = vpop.f32.mrb[88].mxu1  ;;  %v1689_v9 = vpop.f32.mrb[88].mxu0 }
 0x1d9   :  { %v1402_v10 = vpop.f32.mrb[89].mxu1  ;;  %v2584_v12 = vsel %vm2455_vm11, %v2390_v5, %v2520_v7  ;;  %v1690_v13 = vadd.f32 %v1689_v9, %v1400_v8  ;;  %v1691_v14 = vpop.f32.mrb[89].mxu0 }
 0x1da   :  { %v1403_v15 = vpop.f32.mrb[90].mxu1  ;;  %v3338_v16 = vpack.c.bf16 %v2584_v12, %v2583_v11  ;;  %v1692_v17 = vpop.f32.mrb[90].mxu0 }
 0x1db   :  { %v1405_v18 = vpop.f32.mrb[91].mxu1  ;;  %v2391_v19 = vmul.f32 %v2250_v6, %v1690_v13  ;;  %v1693_v20 = vadd.f32 %v1692_v17, %v1403_v15  ;;  %v1694_v21 = vpop.f32.mrb[91].mxu0 }
 0x1dc   :  { %3410 = vst [vmem:[#allocation7 + $0xa8] sm:$0xff] %v3338_v16   ;;  %v2275_v61 = vpop.permute.xlu1 %2274  ;;  %v2280_v0 = vpop.permute.xlu0 %2279 }
 0x1dd   :  { %v2521_v23 = vmul.f32 %v4135_v26, %v2391_v19  ;;  %v2392_v24 = vmul.f32 %v2255_v22, %v1693_v20  ;;  %vm2456_vm12 = vcmp.ge.f32.partialorder %v2391_v19, 0.0 }
 0x1df   :  { %vm2457_vm13 = vcmp.ge.f32.partialorder %v2392_v24, 0.0  ;;  %v2522_v27 = vmul.f32 %v4135_v26, %v2392_v24  ;;  %v2585_v31 = vsel %vm2456_vm12, %v2391_v19, %v2521_v23 }
 0x1e0   :  { %v1408_v28 = vpop.f32.mrb[92].mxu1  ;;  %v1697_v29 = vpop.f32.mrb[92].mxu0 }
 0x1e1   :  { %v1410_v30 = vpop.f32.mrb[93].mxu1  ;;  %v2586_v32 = vsel %vm2457_vm13, %v2392_v24, %v2522_v27  ;;  %v1698_v33 = vadd.f32 %v1697_v29, %v1408_v28  ;;  %v1699_v34 = vpop.f32.mrb[93].mxu0 }
 0x1e2   :  { %v1411_v35 = vpop.f32.mrb[94].mxu1  ;;  %v3343_v36 = vpack.c.bf16 %v2586_v32, %v2585_v31  ;;  %v1700_v37 = vpop.f32.mrb[94].mxu0 }
 0x1e3   :  { %v1413_v38 = vpop.f32.mrb[95].mxu1  ;;  %v2393_v39 = vmul.f32 %v2260_v25, %v1698_v33  ;;  %v1701_v40 = vadd.f32 %v1700_v37, %v1411_v35  ;;  %v1702_v41 = vpop.f32.mrb[95].mxu0 }
 0x1e4   :  { %3411 = vst [vmem:[#allocation7 + $0xb0] sm:$0xff] %v3343_v36   ;;  %v2285_v16 = vpop.permute.xlu1 %2284  ;;  %v2290_v19 = vpop.permute.xlu0 %2289 }
 0x1e5   :  { %v2523_v43 = vmul.f32 %v4135_v26, %v2393_v39  ;;  %v2394_v44 = vmul.f32 %v2265_v42, %v1701_v40  ;;  %vm2458_vm14 = vcmp.ge.f32.partialorder %v2393_v39, 0.0 }
 0x1e7   :  { %vm2459_vm15 = vcmp.ge.f32.partialorder %v2394_v44, 0.0  ;;  %v2524_v46 = vmul.f32 %v4135_v26, %v2394_v44  ;;  %v2587_v50 = vsel %vm2458_vm14, %v2393_v39, %v2523_v43 }
 0x1e8   :  { %v1416_v47 = vpop.f32.mrb[96].mxu1  ;;  %v1705_v48 = vpop.f32.mrb[96].mxu0 }
 0x1e9   :  { %v1418_v49 = vpop.f32.mrb[97].mxu1  ;;  %v2588_v51 = vsel %vm2459_vm15, %v2394_v44, %v2524_v46  ;;  %v1706_v52 = vadd.f32 %v1705_v48, %v1416_v47  ;;  %v1707_v53 = vpop.f32.mrb[97].mxu0 }
 0x1ea   :  { %v1419_v54 = vpop.f32.mrb[98].mxu1  ;;  %v3348_v55 = vpack.c.bf16 %v2588_v51, %v2587_v50  ;;  %v1708_v56 = vpop.f32.mrb[98].mxu0 }
 0x1eb   :  { %v1421_v57 = vpop.f32.mrb[99].mxu1  ;;  %v2395_v58 = vmul.f32 %v2270_v45, %v1706_v52  ;;  %v1709_v59 = vadd.f32 %v1708_v56, %v1419_v54  ;;  %v1710_v60 = vpop.f32.mrb[99].mxu0 }
 0x1ec   :  { %3412 = vst [vmem:[#allocation7 + $0xb8] sm:$0xff] %v3348_v55   ;;  %v2295_v36 = vpop.permute.xlu1 %2294  ;;  %v2300_v39 = vpop.permute.xlu0 %2299 }
 0x1ed   :  { %v2525_v62 = vmul.f32 %v4135_v26, %v2395_v58  ;;  %v2396_v63 = vmul.f32 %v2275_v61, %v1709_v59  ;;  %vm2460_vm0 = vcmp.ge.f32.partialorder %v2395_v58, 0.0 }
 0x1ef   :  { %vm2461_vm1 = vcmp.ge.f32.partialorder %v2396_v63, 0.0  ;;  %v2526_v1 = vmul.f32 %v4135_v26, %v2396_v63  ;;  %v2589_v5 = vsel %vm2460_vm0, %v2395_v58, %v2525_v62 }
 0x1f0   :  { %v1424_v2 = vpop.f32.mrb[100].mxu1  ;;  %v1713_v3 = vpop.f32.mrb[100].mxu0 }
 0x1f1   :  { %v1426_v4 = vpop.f32.mrb[101].mxu1  ;;  %v2590_v6 = vsel %vm2461_vm1, %v2396_v63, %v2526_v1  ;;  %v1714_v7 = vadd.f32 %v1713_v3, %v1424_v2  ;;  %v1715_v8 = vpop.f32.mrb[101].mxu0 }
 0x1f2   :  { %v1427_v9 = vpop.f32.mrb[102].mxu1  ;;  %v3353_v10 = vpack.c.bf16 %v2590_v6, %v2589_v5  ;;  %v1716_v11 = vpop.f32.mrb[102].mxu0 }
 0x1f3   :  { %v1429_v12 = vpop.f32.mrb[103].mxu1  ;;  %v2397_v13 = vmul.f32 %v2280_v0, %v1714_v7  ;;  %v1717_v14 = vadd.f32 %v1716_v11, %v1427_v9  ;;  %v1718_v15 = vpop.f32.mrb[103].mxu0 }
 0x1f4   :  { %3413 = vst [vmem:[#allocation7 + $0xc0] sm:$0xff] %v3353_v10   ;;  %v2305_v55 = vpop.permute.xlu1 %2304  ;;  %v2310_v58 = vpop.permute.xlu0 %2309 }
 0x1f5   :  { %v2527_v17 = vmul.f32 %v4135_v26, %v2397_v13  ;;  %v2398_v18 = vmul.f32 %v2285_v16, %v1717_v14  ;;  %vm2462_vm2 = vcmp.ge.f32.partialorder %v2397_v13, 0.0 }
 0x1f7   :  { %vm2463_vm3 = vcmp.ge.f32.partialorder %v2398_v18, 0.0  ;;  %v2528_v20 = vmul.f32 %v4135_v26, %v2398_v18  ;;  %v2591_v24 = vsel %vm2462_vm2, %v2397_v13, %v2527_v17 }
 0x1f8   :  { %v1432_v21 = vpop.f32.mrb[104].mxu1  ;;  %v1721_v22 = vpop.f32.mrb[104].mxu0 }
 0x1f9   :  { %v1434_v23 = vpop.f32.mrb[105].mxu1  ;;  %v2592_v25 = vsel %vm2463_vm3, %v2398_v18, %v2528_v20  ;;  %v1722_v27 = vadd.f32 %v1721_v22, %v1432_v21  ;;  %v1723_v28 = vpop.f32.mrb[105].mxu0 }
 0x1fa   :  { %v1435_v29 = vpop.f32.mrb[106].mxu1  ;;  %v3358_v30 = vpack.c.bf16 %v2592_v25, %v2591_v24  ;;  %v1724_v31 = vpop.f32.mrb[106].mxu0 }
 0x1fb   :  { %v1437_v32 = vpop.f32.mrb[107].mxu1  ;;  %v2399_v33 = vmul.f32 %v2290_v19, %v1722_v27  ;;  %v1725_v34 = vadd.f32 %v1724_v31, %v1435_v29  ;;  %v1726_v35 = vpop.f32.mrb[107].mxu0 }
 0x1fc   :  { %3414 = vst [vmem:[#allocation7 + $0xc8] sm:$0xff] %v3358_v30   ;;  %v2315_v10 = vpop.permute.xlu1 %2314  ;;  %v2320_v13 = vpop.permute.xlu0 %2319 }
 0x1fd   :  { %v2529_v37 = vmul.f32 %v4135_v26, %v2399_v33  ;;  %v2400_v38 = vmul.f32 %v2295_v36, %v1725_v34  ;;  %vm2464_vm4 = vcmp.ge.f32.partialorder %v2399_v33, 0.0 }
 0x1ff   :  { %vm2465_vm5 = vcmp.ge.f32.partialorder %v2400_v38, 0.0  ;;  %v2530_v40 = vmul.f32 %v4135_v26, %v2400_v38  ;;  %v2593_v44 = vsel %vm2464_vm4, %v2399_v33, %v2529_v37 }
 0x200   :  { %v1440_v41 = vpop.f32.mrb[108].mxu1  ;;  %v1729_v42 = vpop.f32.mrb[108].mxu0 }
 0x201   :  { %v1442_v43 = vpop.f32.mrb[109].mxu1  ;;  %v2594_v45 = vsel %vm2465_vm5, %v2400_v38, %v2530_v40  ;;  %v1730_v46 = vadd.f32 %v1729_v42, %v1440_v41  ;;  %v1731_v47 = vpop.f32.mrb[109].mxu0 }
 0x202   :  { %v1443_v48 = vpop.f32.mrb[110].mxu1  ;;  %v3363_v49 = vpack.c.bf16 %v2594_v45, %v2593_v44  ;;  %v1732_v50 = vpop.f32.mrb[110].mxu0 }
 0x203   :  { %v1445_v51 = vpop.f32.mrb[111].mxu1  ;;  %v2401_v52 = vmul.f32 %v2300_v39, %v1730_v46  ;;  %v1733_v53 = vadd.f32 %v1732_v50, %v1443_v48  ;;  %v1734_v54 = vpop.f32.mrb[111].mxu0 }
 0x204   :  { %3415 = vst [vmem:[#allocation7 + $0xd0] sm:$0xff] %v3363_v49   ;;  %v2325_v30 = vpop.permute.xlu1 %2324  ;;  %v2330_v33 = vpop.permute.xlu0 %2329 }
 0x205   :  { %v2531_v56 = vmul.f32 %v4135_v26, %v2401_v52  ;;  %v2402_v57 = vmul.f32 %v2305_v55, %v1733_v53  ;;  %vm2466_vm6 = vcmp.ge.f32.partialorder %v2401_v52, 0.0 }
 0x207   :  { %vm2467_vm7 = vcmp.ge.f32.partialorder %v2402_v57, 0.0  ;;  %v2532_v59 = vmul.f32 %v4135_v26, %v2402_v57  ;;  %v2595_v63 = vsel %vm2466_vm6, %v2401_v52, %v2531_v56 }
 0x208   :  { %v1448_v60 = vpop.f32.mrb[112].mxu1  ;;  %v1737_v61 = vpop.f32.mrb[112].mxu0 }
 0x209   :  { %v1450_v62 = vpop.f32.mrb[113].mxu1  ;;  %v2596_v0 = vsel %vm2467_vm7, %v2402_v57, %v2532_v59  ;;  %v1738_v1 = vadd.f32 %v1737_v61, %v1448_v60  ;;  %v1739_v2 = vpop.f32.mrb[113].mxu0 }
 0x20a   :  { %v1451_v3 = vpop.f32.mrb[114].mxu1  ;;  %v3368_v4 = vpack.c.bf16 %v2596_v0, %v2595_v63  ;;  %v1740_v5 = vpop.f32.mrb[114].mxu0 }
 0x20b   :  { %v1453_v6 = vpop.f32.mrb[115].mxu1  ;;  %v2403_v7 = vmul.f32 %v2310_v58, %v1738_v1  ;;  %v1741_v8 = vadd.f32 %v1740_v5, %v1451_v3  ;;  %v1742_v9 = vpop.f32.mrb[115].mxu0 }
 0x20c   :  { %3416 = vst [vmem:[#allocation7 + $0xd8] sm:$0xff] %v3368_v4   ;;  %v2335_v49 = vpop.permute.xlu1 %2334  ;;  %v2340_v52 = vpop.permute.xlu0 %2339 }
 0x20d   :  { %v2533_v11 = vmul.f32 %v4135_v26, %v2403_v7  ;;  %v2404_v12 = vmul.f32 %v2315_v10, %v1741_v8  ;;  %vm2468_vm8 = vcmp.ge.f32.partialorder %v2403_v7, 0.0 }
 0x20f   :  { %vm2469_vm9 = vcmp.ge.f32.partialorder %v2404_v12, 0.0  ;;  %v2534_v14 = vmul.f32 %v4135_v26, %v2404_v12  ;;  %v2597_v18 = vsel %vm2468_vm8, %v2403_v7, %v2533_v11 }
 0x210   :  { %v1456_v15 = vpop.f32.mrb[116].mxu1  ;;  %v1745_v16 = vpop.f32.mrb[116].mxu0 }
 0x211   :  { %v1458_v17 = vpop.f32.mrb[117].mxu1  ;;  %v2598_v19 = vsel %vm2469_vm9, %v2404_v12, %v2534_v14  ;;  %v1746_v20 = vadd.f32 %v1745_v16, %v1456_v15  ;;  %v1747_v21 = vpop.f32.mrb[117].mxu0 }
 0x212   :  { %v1459_v22 = vpop.f32.mrb[118].mxu1  ;;  %v3373_v23 = vpack.c.bf16 %v2598_v19, %v2597_v18  ;;  %v1748_v24 = vpop.f32.mrb[118].mxu0 }
 0x213   :  { %v1461_v25 = vpop.f32.mrb[119].mxu1  ;;  %v2405_v27 = vmul.f32 %v2320_v13, %v1746_v20  ;;  %v1749_v28 = vadd.f32 %v1748_v24, %v1459_v22  ;;  %v1750_v29 = vpop.f32.mrb[119].mxu0 }
 0x214   :  { %3417 = vst [vmem:[#allocation7 + $0xe0] sm:$0xff] %v3373_v23   ;;  %v2345_v4 = vpop.permute.xlu1 %2344 }
 0x215   :  { %v2535_v31 = vmul.f32 %v4135_v26, %v2405_v27  ;;  %v2406_v32 = vmul.f32 %v2325_v30, %v1749_v28  ;;  %vm2470_vm10 = vcmp.ge.f32.partialorder %v2405_v27, 0.0 }
 0x217   :  { %vm2471_vm11 = vcmp.ge.f32.partialorder %v2406_v32, 0.0  ;;  %v2536_v34 = vmul.f32 %v4135_v26, %v2406_v32  ;;  %v2599_v38 = vsel %vm2470_vm10, %v2405_v27, %v2535_v31 }
 0x218   :  { %v1464_v35 = vpop.f32.mrb[120].mxu1  ;;  %v1753_v36 = vpop.f32.mrb[120].mxu0 }
 0x219   :  { %v1466_v37 = vpop.f32.mrb[121].mxu1  ;;  %v2600_v39 = vsel %vm2471_vm11, %v2406_v32, %v2536_v34  ;;  %v1754_v40 = vadd.f32 %v1753_v36, %v1464_v35  ;;  %v1755_v41 = vpop.f32.mrb[121].mxu0 }
 0x21a   :  { %v1467_v42 = vpop.f32.mrb[122].mxu1  ;;  %v3378_v43 = vpack.c.bf16 %v2600_v39, %v2599_v38  ;;  %v1756_v44 = vpop.f32.mrb[122].mxu0 }
 0x21b   :  { %v1469_v45 = vpop.f32.mrb[123].mxu1  ;;  %v2407_v46 = vmul.f32 %v2330_v33, %v1754_v40  ;;  %v1757_v47 = vadd.f32 %v1756_v44, %v1467_v42  ;;  %v1758_v48 = vpop.f32.mrb[123].mxu0 }
 0x21c   :  { %3418 = vst [vmem:[#allocation7 + $0xe8] sm:$0xff] %v3378_v43  }
 0x21d   :  { %v2537_v50 = vmul.f32 %v4135_v26, %v2407_v46  ;;  %v2408_v51 = vmul.f32 %v2335_v49, %v1757_v47  ;;  %vm2472_vm12 = vcmp.ge.f32.partialorder %v2407_v46, 0.0 }
 0x21f   :  { %vm2473_vm13 = vcmp.ge.f32.partialorder %v2408_v51, 0.0  ;;  %v2538_v53 = vmul.f32 %v4135_v26, %v2408_v51  ;;  %v2601_v57 = vsel %vm2472_vm12, %v2407_v46, %v2537_v50 }
 0x220   :  { %v1472_v54 = vpop.f32.mrb[124].mxu1  ;;  %v1761_v55 = vpop.f32.mrb[124].mxu0 }
 0x221   :  { %v1474_v56 = vpop.f32.mrb[125].mxu1  ;;  %v2602_v58 = vsel %vm2473_vm13, %v2408_v51, %v2538_v53  ;;  %v1762_v59 = vadd.f32 %v1761_v55, %v1472_v54  ;;  %v1763_v60 = vpop.f32.mrb[125].mxu0 }
 0x222   :  { %v1475_v61 = vpop.f32.mrb[126].mxu1  ;;  %v3383_v62 = vpack.c.bf16 %v2602_v58, %v2601_v57  ;;  %v1764_v63 = vpop.f32.mrb[126].mxu0 }
 0x223   :  { %v1477_v0 = vpop.f32.mrb[127].mxu1  ;;  %v2409_v1 = vmul.f32 %v2340_v52, %v1762_v59  ;;  %v1765_v2 = vadd.f32 %v1764_v63, %v1475_v61  ;;  %v1766_v3 = vpop.f32.mrb[127].mxu0 }
 0x224   :  { %3419 = vst [vmem:[#allocation7 + $0xf0] sm:$0xff] %v3383_v62  }
 0x225   :  { %v2539_v5 = vmul.f32 %v4135_v26, %v2409_v1  ;;  %v2410_v6 = vmul.f32 %v2345_v4, %v1765_v2  ;;  %vm2474_vm14 = vcmp.ge.f32.partialorder %v2409_v1, 0.0 }
 0x227   :  { %vm2475_vm15 = vcmp.ge.f32.partialorder %v2410_v6, 0.0  ;;  %v2540_v7 = vmul.f32 %v4135_v26, %v2410_v6  ;;  %v2603_v8 = vsel %vm2474_vm14, %v2409_v1, %v2539_v5 }
 0x229   :  { %v2604_v9 = vsel %vm2475_vm15, %v2410_v6, %v2540_v7 }
 0x22a   :  { %v3388_v10 = vpack.c.bf16 %v2604_v9, %v2603_v8 }
 0x22c   :  { %3420 = vst [vmem:[#allocation7 + $0xf8] sm:$0xff] %v3388_v10  }
 0x22d   :  { %3751 = shalt.err (!%p3748_p12)
}
 0x22e   :  { %s3752_s6 = scalar_lea.hbm %s4217_s4, 4096 }
 0x22f   :  { %p3753_p13 = scmp.ne.s32.totalorder %s4217_s4, %s3752_s6  ;;  %p3756_p0 = scmp.lt.u32.totalorder %s3752_s6, %s4217_s4 }
 0x231   :  { %p3758_p1 = pnand %p3756_p0, %p3753_p13 }
 0x233   :  { %3761 = shalt.err (!%p3758_p1)
}
 0x234   :  { %s3771_s10 = smov 64   ;;  %s3772_s11 = smov 4  }
 0x235   :  { %2936 = dma.vmem_to_hbm [thread:$0]  %s2931_s28, 4096, %s4217_s4, [#allocation6], %s3771_s10, %s3771_s10, %s3772_s11  }
 0x236   :  { %3764 = dma.done.wait [#allocation6], 4096  }
 0x237   :  { %3765 = vsyncadd [#allocation6], 4294963200 }
 0x238   :  { %2940 = vsyncpa [#allocation5], 1 }
 0x239   :  { %2941 = vsyncpa [#allocation6], 1 }

</bundles_post_ra>
